<compile_context>
chip_gen: v7x
topology: tpu7x:2x2x1
jax: 0.10.0
libtpu: 0.0.40
codegen_flags: <defaults>
</compile_context>

<pallas_src>
import functools
import math

import jax
import jax.numpy as jnp
from jax import lax
from jax.experimental import pallas as pl
from jax.experimental.pallas import tpu as pltpu


# ----------------------------------------------------------------------------
# Constant-slab row layout shared by wrapper and kernel.
# ----------------------------------------------------------------------------
def _const_layout(channels, seq, batch, num_heads):
    pos_row = ((channels + 2 + 7) // 8) * 8                 # sublane-tile aligned
    mask_row = ((pos_row + seq + 7) // 8) * 8
    sel_row = mask_row + num_heads * batch * seq
    n_rows = sel_row + batch
    return pos_row, mask_row, sel_row, n_rows


# ----------------------------------------------------------------------------
# Single fused kernel: full forward pass (token embed + pos enc + L transformer
# blocks + final dense on the last time step) in one grid step.
# ----------------------------------------------------------------------------
def fused_model_kernel(
    x_ref,        # (B*S, C)            raw input, flattened over (batch, seq)
    const_ref,    # (n_rows, W)         packed constants (see _const_layout)
    w_ref,        # (L, max(E,Hff), 5E+Hff)  packed matmul weights per layer
    vec_ref,      # (L, 1, 9E+Hff)      packed biases / LayerNorm params
    o_ref,        # (B, 1)
    *, num_heads, num_layers, batch, seq, channels, embed_dim, hidden,
):
    f32 = jnp.float32
    E, H, S, B = embed_dim, num_heads, seq, batch
    BS = B * S
    G = H * B                                   # super-batch: (head, batch)
    pos_row, mask_row, sel_row, _ = _const_layout(channels, S, B, H)

    # ---- unpack the single constant slab (static ref-view slices) ----
    w_tok = const_ref[0:channels, 0:E]                      # (C, E)
    fin_w = const_ref[channels:channels + 1, 0:E]           # (1, E)
    fin_b = const_ref[channels + 1:channels + 2, 0:1]       # (1, 1)
    pos = const_ref[pos_row:pos_row + S, 0:E]               # (S, E) incl. tok bias
    head_mask = const_ref[mask_row:mask_row + G * S, 0:E].reshape(G, S, E)
    sel_last = const_ref[sel_row:sel_row + B, 0:BS]         # (B, BS) 0/1 selector

    # ---- token embedding (one matmul) + positional encoding (broadcast) ----
    x = jnp.dot(x_ref[...], w_tok, preferred_element_type=f32)      # (BS, E)
    x = (x.reshape(B, S, E) + pos).reshape(BS, E)

    def mm(a, w):
        # Matmul dtype follows the (optionally bf16) weight slab; accumulate f32.
        return jnp.dot(a.astype(w.dtype), w, preferred_element_type=f32)

    def layer_norm(z, g, b):
        mu = jnp.mean(z, axis=-1, keepdims=True)
        var = jnp.mean((z - mu) ** 2, axis=-1, keepdims=True)
        return (z - mu) * lax.rsqrt(var + 1e-5) * g + b

    # ---- stacked TransformerBlocks (statically unrolled) ----
    for l in range(num_layers):
        # static ref-view slices of the packed per-layer slabs
        w_in = w_ref[l, 0:E, 0:3 * E]                        # (E, 3E), Q pre-scaled
        w_out = w_ref[l, 0:E, 3 * E:4 * E]                   # (E, E)
        w1 = w_ref[l, 0:E, 4 * E:4 * E + hidden]             # (E, Hff)
        w2 = w_ref[l, :, 4 * E + hidden:5 * E + hidden]      # (Hff, E)

        b_in = vec_ref[l, :, 0:3 * E]
        b_out = vec_ref[l, :, 3 * E:4 * E]
        ln1_g = vec_ref[l, :, 4 * E:5 * E]
        ln1_b = vec_ref[l, :, 5 * E:6 * E]
        b1 = vec_ref[l, :, 6 * E:6 * E + hidden]
        b2 = vec_ref[l, :, 6 * E + hidden:7 * E + hidden]
        ln2_g = vec_ref[l, :, 7 * E + hidden:8 * E + hidden]
        ln2_b = vec_ref[l, :, 8 * E + hidden:9 * E + hidden]

        # ---- multi-head self-attention, all heads in one pair of einsums ----
        qkv = mm(x, w_in) + b_in                             # (BS, 3E)
        # replicate per head along the leading axis (tile-aligned concat) and
        # zero the columns each head does not own via the precomputed mask.
        qkv_g = jnp.concatenate([qkv] * H, axis=0).reshape(G, S, 3 * E)
        q_g = qkv_g[..., 0:E] * head_mask                    # (G, S, E)
        k_g = qkv_g[..., E:2 * E]
        v_g = qkv_g[..., 2 * E:3 * E]

        s = jnp.einsum('gqe,gke->gqk', q_g, k_g,
                       preferred_element_type=f32)           # (G, S, S)
        s = s - jnp.max(s, axis=-1, keepdims=True)
        p = jnp.exp(s)
        p = p / jnp.sum(p, axis=-1, keepdims=True)           # exact softmax
        ctx = jnp.einsum('gqk,gke->gqe', p, v_g,
                         preferred_element_type=f32) * head_mask
        # "concat heads" == masked sum over the head groups (leading slices)
        attn3 = ctx[0:B]
        for h in range(1, H):
            attn3 = attn3 + ctx[h * B:(h + 1) * B]           # (B, S, E)
        attn = mm(attn3.reshape(BS, E), w_out) + b_out

        # residual + norm1
        x1 = layer_norm(x + attn, ln1_g, ln1_b)

        # FFN: Linear -> GELU(exact erf) -> Linear (dropouts = identity)
        h1 = mm(x1, w1) + b1
        g1 = 0.5 * h1 * (1.0 + lax.erf(h1 * 0.7071067811865476))
        x = layer_norm(x1 + mm(g1, w2) + b2, ln2_g, ln2_b)

    # ---- last time step via static selector matmul + final dense (E -> 1) ----
    last = jnp.dot(sel_last, x, preferred_element_type=f32)  # (B, E)
    out = jnp.sum(last * fin_w, axis=-1, keepdims=True) + fin_b
    o_ref[...] = out.astype(o_ref.dtype)


# ----------------------------------------------------------------------------
# Wrapper: trace-time slab packing + single pallas_call.
# ----------------------------------------------------------------------------
def model_forward(x, params, num_heads, use_bf16_matmul=False):
    f32 = jnp.float32
    B, S, C = x.shape
    d_model = params['tok_w'].shape[1]
    E = C * d_model
    Hff = params['blocks'][0]['w1_T'].shape[1]
    n_layers = len(params['blocks'])
    H = num_heads
    dh = E // H
    BS = B * S
    W = max(E, BS)                                # const-slab width
    pos_row, mask_row, sel_row, n_rows = _const_layout(C, S, B, H)

    def pad_cols(m):
        return jnp.pad(m, ((0, 0), (0, W - m.shape[1])))

    # Token embedding re-expressed as one (C, E) matmul.
    # TODO(synk): TokenEmbedding class not provided upstream; implemented as a
    # shared per-channel Linear(1, d_model) followed by channel flatten.
    w_tok = jnp.kron(jnp.eye(C, dtype=f32), params['tok_w'])           # (C, E)
    b_tok = jnp.tile(params['tok_b'], C).reshape(1, E)
    pos = positional_encoding(S, E) + b_tok                            # (S, E)
    fin_w = params['final_w'].reshape(1, E)
    fin_b_row = jnp.broadcast_to(params['final_b'].astype(f32).reshape(1, 1), (1, E))

    # Per-head column-ownership mask, rows ordered (head, batch, seq).
    head_of_row = jnp.arange(H * B * S, dtype=jnp.int32) // (B * S)
    head_of_col = jnp.arange(E, dtype=jnp.int32) // dh
    head_mask = (head_of_row[:, None] == head_of_col[None, :]).astype(f32)

    # 0/1 selector that picks row (b*S + S-1) of the flattened activations.
    sel_last = (jnp.arange(BS, dtype=jnp.int32)[None, :]
                == (jnp.arange(B, dtype=jnp.int32)[:, None] * S + (S - 1))).astype(f32)
    sel_last = jnp.pad(sel_last, ((0, 0), (0, W - BS)))

    const_slab = jnp.concatenate([
        pad_cols(w_tok),                                   # rows [0, C)
        pad_cols(fin_w),                                   # row C
        pad_cols(fin_b_row),                               # row C+1
        jnp.zeros((pos_row - (C + 2), W), f32),
        pad_cols(pos),                                     # rows [pos_row, +S)
        jnp.zeros((mask_row - (pos_row + S), W), f32),
        pad_cols(head_mask),                               # rows [mask_row, +H*B*S)
        sel_last,                                          # rows [sel_row, +B)
    ], axis=0)
    assert const_slab.shape == (n_rows, W)

    # Matmul-weight slab; fold 1/sqrt(dh) into the Q columns of in_proj.
    q_col_scale = jnp.concatenate([jnp.full((E,), 1.0 / math.sqrt(dh), f32),
                                   jnp.ones((2 * E,), f32)])
    R = max(E, Hff)

    def pad_rows(m):
        return jnp.pad(m, ((0, R - m.shape[0]), (0, 0)))

    def layer_weights(blk):
        left = jnp.concatenate([blk['w_in_T'] * q_col_scale[None, :],   # (E, 3E)
                                blk['w_out_T'],                          # (E, E)
                                blk['w1_T']], axis=1)                    # (E, Hff)
        return jnp.concatenate([pad_rows(left), pad_rows(blk['w2_T'])], axis=1)

    w_slab = jnp.stack([layer_weights(blk) for blk in params['blocks']], axis=0)
    if use_bf16_matmul:
        # v5e/v6e/v7x MXU is bf16-native; elementwise math stays f32 in-kernel.
        w_slab = w_slab.astype(jnp.bfloat16)

    # Bias / LayerNorm vector slab.
    def layer_vectors(blk):
        return jnp.concatenate([blk['b_in'] * q_col_scale[None, :], blk['b_out'],
                                blk['ln1_g'], blk['ln1_b'], blk['b1'], blk['b2'],
                                blk['ln2_g'], blk['ln2_b']], axis=1)

    vec_slab = jnp.stack([layer_vectors(blk) for blk in params['blocks']], axis=0)

    x2d = x.reshape(BS, C).astype(f32)
    call_args = (x2d, const_slab, w_slab, vec_slab)

    def full_spec(a):
        if a.ndim == 2:
            return pl.BlockSpec(a.shape, lambda i: (0, 0))
        return pl.BlockSpec(a.shape, lambda i: (0, 0, 0))

    # Advisory cost estimate so XLA schedules the tiny surrounding ops well.
    flops_layer = (2 * BS * E * 3 * E + 2 * 2 * B * H * S * S * dh
                   + 2 * BS * E * E + 2 * 2 * BS * E * Hff)
    flops = int(2 * BS * C * E + n_layers * flops_layer + 2 * B * BS * E + 2 * B * E)
    transcend = int(n_layers * (B * H * S * S + BS * Hff + 2 * BS))
    bytes_acc = int(sum(a.size * a.dtype.itemsize for a in call_args) + B * 4)

    kernel = functools.partial(fused_model_kernel, num_heads=H,
                               num_layers=n_layers, batch=B, seq=S, channels=C,
                               embed_dim=E, hidden=Hff)

    out2d = pl.pallas_call(
        kernel,
        out_shape=jax.ShapeDtypeStruct((B, 1), f32),
        grid=(1,),   # whole problem in one step; second step overhead > compute
        in_specs=[full_spec(a) for a in call_args],
        out_specs=pl.BlockSpec((B, 1), lambda i: (0, 0)),
        compiler_params=pltpu.CompilerParams(dimension_semantics=("arbitrary",)),
        cost_estimate=pl.CostEstimate(flops=flops, transcendentals=transcend,
                                      bytes_accessed=bytes_acc),
    )(*call_args)

    return out2d[:, None, :]                                  # (B, 1, 1)


# ----------------------------------------------------------------------------
# Parameter construction (deterministic, synthetic) — PyTorch-layout weights.
# ----------------------------------------------------------------------------
def init_block_params(key, E, Hff):
    ks = jax.random.split(key, 8)
    std = 0.02
    w_in = jax.random.normal(ks[0], (3 * E, E), jnp.float32) * std
    b_in = jax.random.normal(ks[1], (3 * E,), jnp.float32) * std
    w_out = jax.random.normal(ks[2], (E, E), jnp.float32) * std
    b_out = jax.random.normal(ks[3], (E,), jnp.float32) * std
    w1 = jax.random.normal(ks[4], (Hff, E), jnp.float32) * std
    b1 = jax.random.normal(ks[5], (Hff,), jnp.float32) * std
    w2 = jax.random.normal(ks[6], (E, Hff), jnp.float32) * std
    b2 = jax.random.normal(ks[7], (E,), jnp.float32) * std
    return {
        'w_in_T': w_in.T,                 # (E, 3E)
        'b_in': b_in.reshape(1, 3 * E),
        'w_out_T': w_out.T,               # (E, E)
        'b_out': b_out.reshape(1, E),
        'ln1_g': jnp.ones((1, E), jnp.float32),
        'ln1_b': jnp.zeros((1, E), jnp.float32),
        'w1_T': w1.T,                     # (E, Hff)
        'b1': b1.reshape(1, Hff),
        'w2_T': w2.T,                     # (Hff, E)
        'b2': b2.reshape(1, E),
        'ln2_g': jnp.ones((1, E), jnp.float32),
        'ln2_b': jnp.zeros((1, E), jnp.float32),
    }


def init_model_params(key, input_dim, d_model, hidden_d_model, num_layers):
    E = input_dim * d_model
    ks = jax.random.split(key, num_layers + 4)
    std = 0.02
    return {
        'tok_w': jax.random.normal(ks[0], (1, d_model), jnp.float32) * std,
        'tok_b': jax.random.normal(ks[1], (d_model,), jnp.float32) * std,
        'final_w': jax.random.normal(ks[2], (1, E), jnp.float32) * std,   # Linear(E,1)
        'final_b': jax.random.normal(ks[3], (1,), jnp.float32) * std,
        'blocks': [init_block_params(ks[4 + i], E, hidden_d_model)
                   for i in range(num_layers)],
    }


def positional_encoding(L, E):
    # TODO(synk): PositionalEmbedding class not provided upstream; standard
    # sinusoidal encoding assumed.
    pos = jnp.arange(L, dtype=jnp.float32)[:, None]
    div = jnp.exp(jnp.arange(0, E, 2, dtype=jnp.float32) * (-math.log(10000.0) / E))
    pe = jnp.zeros((L, E), jnp.float32)
    pe = pe.at[:, 0::2].set(jnp.sin(pos * div))
    pe = pe.at[:, 1::2].set(jnp.cos(pos * div))
    return pe


if __name__ == "__main__":
    INPUT_DIM = 4
    D_MODEL = 8
    NUM_HEADS = 4
    HIDDEN_D_MODEL = 64
    NUM_LAYERS = 2
    BATCH = 2
    SEQ = 8

    key = jax.random.PRNGKey(0)
    k_param, k_x = jax.random.split(key)
    params = init_model_params(k_param, INPUT_DIM, D_MODEL, HIDDEN_D_MODEL, NUM_LAYERS)
    x = jax.random.normal(k_x, (BATCH, SEQ, INPUT_DIM), jnp.float32)

    fwd = jax.jit(functools.partial(model_forward, num_heads=NUM_HEADS))
    out = jax.block_until_ready(fwd(x, params))
    assert out.shape == (BATCH, 1, 1), out.shape
    assert bool(jnp.all(jnp.isfinite(out)))
    print("KERNEL_OK")
</pallas_src>

<mosaic_0001>
module attributes {stable_mosaic.version = 11 : i64} {
  func.func @fused_model_kernel(%arg0: i32, %arg1: memref<16x4xf32, #tpu.memory_space<vmem>>, %arg2: memref<82x32xf32, #tpu.memory_space<vmem>>, %arg3: memref<2x64x224xf32, #tpu.memory_space<vmem>>, %arg4: memref<2x1x352xf32, #tpu.memory_space<vmem>>, %arg5: memref<2x1xf32, #tpu.memory_space<vmem>>) attributes {dimension_semantics = [#tpu.dimension_semantics<arbitrary>], iteration_bounds = array<i64: 1>, scalar_prefetch = 0 : i64, scratch_operands = 0 : i64, tpu.core_type = #tpu.core_type<tc>, window_params = [{pipeline_mode = #tpu.pipeline_mode<synchronous>, transform_indices = @transform_0, window_bounds = array<i64: 16, 4>}, {pipeline_mode = #tpu.pipeline_mode<synchronous>, transform_indices = @transform_1, window_bounds = array<i64: 82, 32>}, {pipeline_mode = #tpu.pipeline_mode<synchronous>, transform_indices = @transform_2, window_bounds = array<i64: 2, 64, 224>}, {pipeline_mode = #tpu.pipeline_mode<synchronous>, transform_indices = @transform_3, window_bounds = array<i64: 2, 1, 352>}, {pipeline_mode = #tpu.pipeline_mode<synchronous>, transform_indices = @transform_4, window_bounds = array<i64: 2, 1>}]} {
    %c0 = arith.constant 0 : index
    %c0_0 = arith.constant 0 : index
    %0 = vector.load %arg2[%c0, %c0_0] : memref<82x32xf32, #tpu.memory_space<vmem>>, vector<4x32xf32>
    %c4 = arith.constant 4 : index
    %c0_1 = arith.constant 0 : index
    %1 = vector.load %arg2[%c4, %c0_1] : memref<82x32xf32, #tpu.memory_space<vmem>>, vector<1x32xf32>
    %c5 = arith.constant 5 : index
    %c0_2 = arith.constant 0 : index
    %2 = vector.load %arg2[%c5, %c0_2] : memref<82x32xf32, #tpu.memory_space<vmem>>, vector<1x1xf32>
    %c8 = arith.constant 8 : index
    %c0_3 = arith.constant 0 : index
    %3 = vector.load %arg2[%c8, %c0_3] : memref<82x32xf32, #tpu.memory_space<vmem>>, vector<8x32xf32>
    %c16 = arith.constant 16 : index
    %c0_4 = arith.constant 0 : index
    %4 = vector.load %arg2[%c16, %c0_4] : memref<82x32xf32, #tpu.memory_space<vmem>>, vector<64x32xf32>
    %5 = vector.shape_cast %4 : vector<64x32xf32> to vector<8x8x32xf32>
    %c80 = arith.constant 80 : index
    %c0_5 = arith.constant 0 : index
    %6 = vector.load %arg2[%c80, %c0_5] : memref<82x32xf32, #tpu.memory_space<vmem>>, vector<2x16xf32>
    %c0_6 = arith.constant 0 : index
    %c0_7 = arith.constant 0 : index
    %7 = vector.load %arg1[%c0_6, %c0_7] : memref<16x4xf32, #tpu.memory_space<vmem>>, vector<16x4xf32>
    %cst = arith.constant dense<0.000000e+00> : vector<16x32xf32>
    %8 = tpu.matmul %7, %0, %cst {dimension_numbers = #tpu.dot_dimension_numbers<[1], [0], [0], [1], [0, 0, 1, 1], [], []>} : vector<16x4xf32>, vector<4x32xf32>, vector<16x32xf32> -> vector<16x32xf32>
    %9 = vector.shape_cast %8 : vector<16x32xf32> to vector<2x8x32xf32>
    %10 = vector.shape_cast %3 : vector<8x32xf32> to vector<1x8x32xf32>
    %11 = vector.broadcast %10 : vector<1x8x32xf32> to vector<2x8x32xf32>
    %12 = arith.addf %9, %11 : vector<2x8x32xf32>
    %13 = vector.shape_cast %12 : vector<2x8x32xf32> to vector<16x32xf32>
    %c0_8 = arith.constant 0 : index
    %c0_9 = arith.constant 0 : index
    %c0_10 = arith.constant 0 : index
    %14 = vector.load %arg3[%c0_8, %c0_9, %c0_10] : memref<2x64x224xf32, #tpu.memory_space<vmem>>, vector<1x32x96xf32>
    %15 = vector.shape_cast %14 : vector<1x32x96xf32> to vector<32x96xf32>
    %c0_11 = arith.constant 0 : index
    %c0_12 = arith.constant 0 : index
    %c96 = arith.constant 96 : index
    %16 = vector.load %arg3[%c0_11, %c0_12, %c96] : memref<2x64x224xf32, #tpu.memory_space<vmem>>, vector<1x32x32xf32>
    %17 = vector.shape_cast %16 : vector<1x32x32xf32> to vector<32x32xf32>
    %c0_13 = arith.constant 0 : index
    %c0_14 = arith.constant 0 : index
    %c128 = arith.constant 128 : index
    %18 = vector.load %arg3[%c0_13, %c0_14, %c128] : memref<2x64x224xf32, #tpu.memory_space<vmem>>, vector<1x32x64xf32>
    %19 = vector.shape_cast %18 : vector<1x32x64xf32> to vector<32x64xf32>
    %c0_15 = arith.constant 0 : index
    %c0_16 = arith.constant 0 : index
    %c192 = arith.constant 192 : index
    %20 = vector.load %arg3[%c0_15, %c0_16, %c192] : memref<2x64x224xf32, #tpu.memory_space<vmem>>, vector<1x64x32xf32>
    %21 = vector.shape_cast %20 : vector<1x64x32xf32> to vector<64x32xf32>
    %c0_17 = arith.constant 0 : index
    %c0_18 = arith.constant 0 : index
    %c0_19 = arith.constant 0 : index
    %22 = vector.load %arg4[%c0_17, %c0_18, %c0_19] : memref<2x1x352xf32, #tpu.memory_space<vmem>>, vector<1x1x96xf32>
    %23 = vector.shape_cast %22 : vector<1x1x96xf32> to vector<1x96xf32>
    %c0_20 = arith.constant 0 : index
    %c0_21 = arith.constant 0 : index
    %c96_22 = arith.constant 96 : index
    %24 = vector.load %arg4[%c0_20, %c0_21, %c96_22] : memref<2x1x352xf32, #tpu.memory_space<vmem>>, vector<1x1x32xf32>
    %25 = vector.shape_cast %24 : vector<1x1x32xf32> to vector<1x32xf32>
    %c0_23 = arith.constant 0 : index
    %c0_24 = arith.constant 0 : index
    %c128_25 = arith.constant 128 : index
    %26 = vector.load %arg4[%c0_23, %c0_24, %c128_25] : memref<2x1x352xf32, #tpu.memory_space<vmem>>, vector<1x1x32xf32>
    %27 = vector.shape_cast %26 : vector<1x1x32xf32> to vector<1x32xf32>
    %c0_26 = arith.constant 0 : index
    %c0_27 = arith.constant 0 : index
    %c160 = arith.constant 160 : index
    %28 = vector.load %arg4[%c0_26, %c0_27, %c160] : memref<2x1x352xf32, #tpu.memory_space<vmem>>, vector<1x1x32xf32>
    %29 = vector.shape_cast %28 : vector<1x1x32xf32> to vector<1x32xf32>
    %c0_28 = arith.constant 0 : index
    %c0_29 = arith.constant 0 : index
    %c192_30 = arith.constant 192 : index
    %30 = vector.load %arg4[%c0_28, %c0_29, %c192_30] : memref<2x1x352xf32, #tpu.memory_space<vmem>>, vector<1x1x64xf32>
    %31 = vector.shape_cast %30 : vector<1x1x64xf32> to vector<1x64xf32>
    %c0_31 = arith.constant 0 : index
    %c0_32 = arith.constant 0 : index
    %c256 = arith.constant 256 : index
    %32 = vector.load %arg4[%c0_31, %c0_32, %c256] : memref<2x1x352xf32, #tpu.memory_space<vmem>>, vector<1x1x32xf32>
    %33 = vector.shape_cast %32 : vector<1x1x32xf32> to vector<1x32xf32>
    %c0_33 = arith.constant 0 : index
    %c0_34 = arith.constant 0 : index
    %c288 = arith.constant 288 : index
    %34 = vector.load %arg4[%c0_33, %c0_34, %c288] : memref<2x1x352xf32, #tpu.memory_space<vmem>>, vector<1x1x32xf32>
    %35 = vector.shape_cast %34 : vector<1x1x32xf32> to vector<1x32xf32>
    %c0_35 = arith.constant 0 : index
    %c0_36 = arith.constant 0 : index
    %c320 = arith.constant 320 : index
    %36 = vector.load %arg4[%c0_35, %c0_36, %c320] : memref<2x1x352xf32, #tpu.memory_space<vmem>>, vector<1x1x32xf32>
    %37 = vector.shape_cast %36 : vector<1x1x32xf32> to vector<1x32xf32>
    %cst_37 = arith.constant dense<0.000000e+00> : vector<16x96xf32>
    %38 = tpu.matmul %13, %15, %cst_37 {dimension_numbers = #tpu.dot_dimension_numbers<[1], [0], [0], [1], [0, 0, 1, 1], [], []>} : vector<16x32xf32>, vector<32x96xf32>, vector<16x96xf32> -> vector<16x96xf32>
    %39 = vector.broadcast %23 : vector<1x96xf32> to vector<16x96xf32>
    %40 = arith.addf %38, %39 : vector<16x96xf32>
    %41 = tpu.concatenate %40, %40, %40, %40 in 0 : vector<16x96xf32>, vector<16x96xf32>, vector<16x96xf32>, vector<16x96xf32> -> vector<64x96xf32>
    %42 = vector.shape_cast %41 : vector<64x96xf32> to vector<8x8x96xf32>
    %43 = vector.extract_strided_slice %42 {offsets = [0, 0, 0], sizes = [8, 8, 32], strides = [1, 1, 1]} : vector<8x8x96xf32> to vector<8x8x32xf32>
    %44 = arith.mulf %43, %5 : vector<8x8x32xf32>
    %45 = vector.extract_strided_slice %42 {offsets = [0, 0, 32], sizes = [8, 8, 32], strides = [1, 1, 1]} : vector<8x8x96xf32> to vector<8x8x32xf32>
    %46 = vector.extract_strided_slice %42 {offsets = [0, 0, 64], sizes = [8, 8, 32], strides = [1, 1, 1]} : vector<8x8x96xf32> to vector<8x8x32xf32>
    "tpu.trace_start"() <{level = 10 : i32, message = "gqe,gke->gqk"}> : () -> ()
    %cst_38 = arith.constant dense<0.000000e+00> : vector<8x8x8xf32>
    %47 = tpu.matmul %44, %45, %cst_38 {dimension_numbers = #tpu.dot_dimension_numbers<[2], [2], [1], [1], [0, 0, 0, 1, 1, 1], [0], [0]>} : vector<8x8x32xf32>, vector<8x8x32xf32>, vector<8x8x8xf32> -> vector<8x8x8xf32>
    "tpu.trace_stop"() : () -> ()
    %cst_39 = arith.constant dense<0xFF800000> : vector<8x8xf32>
    %48 = vector.multi_reduction <maximumf>, %47, %cst_39 [2] : vector<8x8x8xf32> to vector<8x8xf32>
    %49 = vector.shape_cast %48 : vector<8x8xf32> to vector<8x8x1xf32>
    %50 = vector.broadcast %49 : vector<8x8x1xf32> to vector<8x8x8xf32>
    %51 = arith.subf %47, %50 : vector<8x8x8xf32>
    %52 = math.exp %51 : vector<8x8x8xf32>
    %cst_40 = arith.constant dense<0.000000e+00> : vector<8x8xf32>
    %53 = vector.multi_reduction <add>, %52, %cst_40 [2] : vector<8x8x8xf32> to vector<8x8xf32>
    %54 = vector.shape_cast %53 : vector<8x8xf32> to vector<8x8x1xf32>
    %55 = vector.broadcast %54 : vector<8x8x1xf32> to vector<8x8x8xf32>
    %56 = arith.divf %52, %55 : vector<8x8x8xf32>
    "tpu.trace_start"() <{level = 10 : i32, message = "gqk,gke->gqe"}> : () -> ()
    %cst_41 = arith.constant dense<0.000000e+00> : vector<8x8x32xf32>
    %57 = tpu.matmul %56, %46, %cst_41 {dimension_numbers = #tpu.dot_dimension_numbers<[2], [1], [1], [2], [0, 0, 0, 1, 1, 2], [0], [0]>} : vector<8x8x8xf32>, vector<8x8x32xf32>, vector<8x8x32xf32> -> vector<8x8x32xf32>
    "tpu.trace_stop"() : () -> ()
    %58 = arith.mulf %57, %5 : vector<8x8x32xf32>
    %59 = vector.extract_strided_slice %58 {offsets = [0, 0, 0], sizes = [2, 8, 32], strides = [1, 1, 1]} : vector<8x8x32xf32> to vector<2x8x32xf32>
    %60 = vector.extract_strided_slice %58 {offsets = [2, 0, 0], sizes = [2, 8, 32], strides = [1, 1, 1]} : vector<8x8x32xf32> to vector<2x8x32xf32>
    %61 = arith.addf %59, %60 : vector<2x8x32xf32>
    %62 = vector.extract_strided_slice %58 {offsets = [4, 0, 0], sizes = [2, 8, 32], strides = [1, 1, 1]} : vector<8x8x32xf32> to vector<2x8x32xf32>
    %63 = arith.addf %61, %62 : vector<2x8x32xf32>
    %64 = vector.extract_strided_slice %58 {offsets = [6, 0, 0], sizes = [2, 8, 32], strides = [1, 1, 1]} : vector<8x8x32xf32> to vector<2x8x32xf32>
    %65 = arith.addf %63, %64 : vector<2x8x32xf32>
    %66 = vector.shape_cast %65 : vector<2x8x32xf32> to vector<16x32xf32>
    %cst_42 = arith.constant dense<0.000000e+00> : vector<16x32xf32>
    %67 = tpu.matmul %66, %17, %cst_42 {dimension_numbers = #tpu.dot_dimension_numbers<[1], [0], [0], [1], [0, 0, 1, 1], [], []>} : vector<16x32xf32>, vector<32x32xf32>, vector<16x32xf32> -> vector<16x32xf32>
    %68 = vector.broadcast %25 : vector<1x32xf32> to vector<16x32xf32>
    %69 = arith.addf %67, %68 : vector<16x32xf32>
    %70 = arith.addf %13, %69 : vector<16x32xf32>
    %cst_43 = arith.constant dense<0.000000e+00> : vector<16xf32>
    %71 = vector.multi_reduction <add>, %70, %cst_43 [1] : vector<16x32xf32> to vector<16xf32>
    %72 = vector.shape_cast %71 : vector<16xf32> to vector<16x1xf32>
    %cst_44 = arith.constant 3.200000e+01 : f32
    %73 = vector.broadcast %cst_44 : f32 to vector<16x1xf32>
    %74 = arith.divf %72, %73 : vector<16x1xf32>
    %75 = vector.broadcast %74 : vector<16x1xf32> to vector<16x32xf32>
    %76 = arith.subf %70, %75 : vector<16x32xf32>
    %77 = arith.mulf %76, %76 : vector<16x32xf32>
    %cst_45 = arith.constant dense<0.000000e+00> : vector<16xf32>
    %78 = vector.multi_reduction <add>, %77, %cst_45 [1] : vector<16x32xf32> to vector<16xf32>
    %79 = vector.shape_cast %78 : vector<16xf32> to vector<16x1xf32>
    %cst_46 = arith.constant 3.200000e+01 : f32
    %80 = vector.broadcast %cst_46 : f32 to vector<16x1xf32>
    %81 = arith.divf %79, %80 : vector<16x1xf32>
    %82 = vector.broadcast %74 : vector<16x1xf32> to vector<16x32xf32>
    %83 = arith.subf %70, %82 : vector<16x32xf32>
    %cst_47 = arith.constant 9.99999974E-6 : f32
    %84 = vector.broadcast %cst_47 : f32 to vector<16x1xf32>
    %85 = arith.addf %81, %84 : vector<16x1xf32>
    %86 = math.rsqrt %85 : vector<16x1xf32>
    %87 = vector.broadcast %86 : vector<16x1xf32> to vector<16x32xf32>
    %88 = arith.mulf %83, %87 : vector<16x32xf32>
    %89 = vector.broadcast %27 : vector<1x32xf32> to vector<16x32xf32>
    %90 = arith.mulf %88, %89 : vector<16x32xf32>
    %91 = vector.broadcast %29 : vector<1x32xf32> to vector<16x32xf32>
    %92 = arith.addf %90, %91 : vector<16x32xf32>
    %cst_48 = arith.constant dense<0.000000e+00> : vector<16x64xf32>
    %93 = tpu.matmul %92, %19, %cst_48 {dimension_numbers = #tpu.dot_dimension_numbers<[1], [0], [0], [1], [0, 0, 1, 1], [], []>} : vector<16x32xf32>, vector<32x64xf32>, vector<16x64xf32> -> vector<16x64xf32>
    %94 = vector.broadcast %31 : vector<1x64xf32> to vector<16x64xf32>
    %95 = arith.addf %93, %94 : vector<16x64xf32>
    %cst_49 = arith.constant 5.000000e-01 : f32
    %96 = vector.broadcast %cst_49 : f32 to vector<16x64xf32>
    %97 = arith.mulf %96, %95 : vector<16x64xf32>
    %cst_50 = arith.constant 0.707106769 : f32
    %98 = vector.broadcast %cst_50 : f32 to vector<16x64xf32>
    %99 = arith.mulf %95, %98 : vector<16x64xf32>
    %100 = math.erf %99 : vector<16x64xf32>
    %cst_51 = arith.constant 1.000000e+00 : f32
    %101 = vector.broadcast %cst_51 : f32 to vector<16x64xf32>
    %102 = arith.addf %101, %100 : vector<16x64xf32>
    %103 = arith.mulf %97, %102 : vector<16x64xf32>
    %cst_52 = arith.constant dense<0.000000e+00> : vector<16x32xf32>
    %104 = tpu.matmul %103, %21, %cst_52 {dimension_numbers = #tpu.dot_dimension_numbers<[1], [0], [0], [1], [0, 0, 1, 1], [], []>} : vector<16x64xf32>, vector<64x32xf32>, vector<16x32xf32> -> vector<16x32xf32>
    %105 = arith.addf %92, %104 : vector<16x32xf32>
    %106 = vector.broadcast %33 : vector<1x32xf32> to vector<16x32xf32>
    %107 = arith.addf %105, %106 : vector<16x32xf32>
    %cst_53 = arith.constant dense<0.000000e+00> : vector<16xf32>
    %108 = vector.multi_reduction <add>, %107, %cst_53 [1] : vector<16x32xf32> to vector<16xf32>
    %109 = vector.shape_cast %108 : vector<16xf32> to vector<16x1xf32>
    %cst_54 = arith.constant 3.200000e+01 : f32
    %110 = vector.broadcast %cst_54 : f32 to vector<16x1xf32>
    %111 = arith.divf %109, %110 : vector<16x1xf32>
    %112 = vector.broadcast %111 : vector<16x1xf32> to vector<16x32xf32>
    %113 = arith.subf %107, %112 : vector<16x32xf32>
    %114 = arith.mulf %113, %113 : vector<16x32xf32>
    %cst_55 = arith.constant dense<0.000000e+00> : vector<16xf32>
    %115 = vector.multi_reduction <add>, %114, %cst_55 [1] : vector<16x32xf32> to vector<16xf32>
    %116 = vector.shape_cast %115 : vector<16xf32> to vector<16x1xf32>
    %cst_56 = arith.constant 3.200000e+01 : f32
    %117 = vector.broadcast %cst_56 : f32 to vector<16x1xf32>
    %118 = arith.divf %116, %117 : vector<16x1xf32>
    %119 = vector.broadcast %111 : vector<16x1xf32> to vector<16x32xf32>
    %120 = arith.subf %107, %119 : vector<16x32xf32>
    %cst_57 = arith.constant 9.99999974E-6 : f32
    %121 = vector.broadcast %cst_57 : f32 to vector<16x1xf32>
    %122 = arith.addf %118, %121 : vector<16x1xf32>
    %123 = math.rsqrt %122 : vector<16x1xf32>
    %124 = vector.broadcast %123 : vector<16x1xf32> to vector<16x32xf32>
    %125 = arith.mulf %120, %124 : vector<16x32xf32>
    %126 = vector.broadcast %35 : vector<1x32xf32> to vector<16x32xf32>
    %127 = arith.mulf %125, %126 : vector<16x32xf32>
    %128 = vector.broadcast %37 : vector<1x32xf32> to vector<16x32xf32>
    %129 = arith.addf %127, %128 : vector<16x32xf32>
    %c1 = arith.constant 1 : index
    %c0_58 = arith.constant 0 : index
    %c0_59 = arith.constant 0 : index
    %130 = vector.load %arg3[%c1, %c0_58, %c0_59] : memref<2x64x224xf32, #tpu.memory_space<vmem>>, vector<1x32x96xf32>
    %131 = vector.shape_cast %130 : vector<1x32x96xf32> to vector<32x96xf32>
    %c1_60 = arith.constant 1 : index
    %c0_61 = arith.constant 0 : index
    %c96_62 = arith.constant 96 : index
    %132 = vector.load %arg3[%c1_60, %c0_61, %c96_62] : memref<2x64x224xf32, #tpu.memory_space<vmem>>, vector<1x32x32xf32>
    %133 = vector.shape_cast %132 : vector<1x32x32xf32> to vector<32x32xf32>
    %c1_63 = arith.constant 1 : index
    %c0_64 = arith.constant 0 : index
    %c128_65 = arith.constant 128 : index
    %134 = vector.load %arg3[%c1_63, %c0_64, %c128_65] : memref<2x64x224xf32, #tpu.memory_space<vmem>>, vector<1x32x64xf32>
    %135 = vector.shape_cast %134 : vector<1x32x64xf32> to vector<32x64xf32>
    %c1_66 = arith.constant 1 : index
    %c0_67 = arith.constant 0 : index
    %c192_68 = arith.constant 192 : index
    %136 = vector.load %arg3[%c1_66, %c0_67, %c192_68] : memref<2x64x224xf32, #tpu.memory_space<vmem>>, vector<1x64x32xf32>
    %137 = vector.shape_cast %136 : vector<1x64x32xf32> to vector<64x32xf32>
    %c1_69 = arith.constant 1 : index
    %c0_70 = arith.constant 0 : index
    %c0_71 = arith.constant 0 : index
    %138 = vector.load %arg4[%c1_69, %c0_70, %c0_71] : memref<2x1x352xf32, #tpu.memory_space<vmem>>, vector<1x1x96xf32>
    %139 = vector.shape_cast %138 : vector<1x1x96xf32> to vector<1x96xf32>
    %c1_72 = arith.constant 1 : index
    %c0_73 = arith.constant 0 : index
    %c96_74 = arith.constant 96 : index
    %140 = vector.load %arg4[%c1_72, %c0_73, %c96_74] : memref<2x1x352xf32, #tpu.memory_space<vmem>>, vector<1x1x32xf32>
    %141 = vector.shape_cast %140 : vector<1x1x32xf32> to vector<1x32xf32>
    %c1_75 = arith.constant 1 : index
    %c0_76 = arith.constant 0 : index
    %c128_77 = arith.constant 128 : index
    %142 = vector.load %arg4[%c1_75, %c0_76, %c128_77] : memref<2x1x352xf32, #tpu.memory_space<vmem>>, vector<1x1x32xf32>
    %143 = vector.shape_cast %142 : vector<1x1x32xf32> to vector<1x32xf32>
    %c1_78 = arith.constant 1 : index
    %c0_79 = arith.constant 0 : index
    %c160_80 = arith.constant 160 : index
    %144 = vector.load %arg4[%c1_78, %c0_79, %c160_80] : memref<2x1x352xf32, #tpu.memory_space<vmem>>, vector<1x1x32xf32>
    %145 = vector.shape_cast %144 : vector<1x1x32xf32> to vector<1x32xf32>
    %c1_81 = arith.constant 1 : index
    %c0_82 = arith.constant 0 : index
    %c192_83 = arith.constant 192 : index
    %146 = vector.load %arg4[%c1_81, %c0_82, %c192_83] : memref<2x1x352xf32, #tpu.memory_space<vmem>>, vector<1x1x64xf32>
    %147 = vector.shape_cast %146 : vector<1x1x64xf32> to vector<1x64xf32>
    %c1_84 = arith.constant 1 : index
    %c0_85 = arith.constant 0 : index
    %c256_86 = arith.constant 256 : index
    %148 = vector.load %arg4[%c1_84, %c0_85, %c256_86] : memref<2x1x352xf32, #tpu.memory_space<vmem>>, vector<1x1x32xf32>
    %149 = vector.shape_cast %148 : vector<1x1x32xf32> to vector<1x32xf32>
    %c1_87 = arith.constant 1 : index
    %c0_88 = arith.constant 0 : index
    %c288_89 = arith.constant 288 : index
    %150 = vector.load %arg4[%c1_87, %c0_88, %c288_89] : memref<2x1x352xf32, #tpu.memory_space<vmem>>, vector<1x1x32xf32>
    %151 = vector.shape_cast %150 : vector<1x1x32xf32> to vector<1x32xf32>
    %c1_90 = arith.constant 1 : index
    %c0_91 = arith.constant 0 : index
    %c320_92 = arith.constant 320 : index
    %152 = vector.load %arg4[%c1_90, %c0_91, %c320_92] : memref<2x1x352xf32, #tpu.memory_space<vmem>>, vector<1x1x32xf32>
    %153 = vector.shape_cast %152 : vector<1x1x32xf32> to vector<1x32xf32>
    %cst_93 = arith.constant dense<0.000000e+00> : vector<16x96xf32>
    %154 = tpu.matmul %129, %131, %cst_93 {dimension_numbers = #tpu.dot_dimension_numbers<[1], [0], [0], [1], [0, 0, 1, 1], [], []>} : vector<16x32xf32>, vector<32x96xf32>, vector<16x96xf32> -> vector<16x96xf32>
    %155 = vector.broadcast %139 : vector<1x96xf32> to vector<16x96xf32>
    %156 = arith.addf %154, %155 : vector<16x96xf32>
    %157 = tpu.concatenate %156, %156, %156, %156 in 0 : vector<16x96xf32>, vector<16x96xf32>, vector<16x96xf32>, vector<16x96xf32> -> vector<64x96xf32>
    %158 = vector.shape_cast %157 : vector<64x96xf32> to vector<8x8x96xf32>
    %159 = vector.extract_strided_slice %158 {offsets = [0, 0, 0], sizes = [8, 8, 32], strides = [1, 1, 1]} : vector<8x8x96xf32> to vector<8x8x32xf32>
    %160 = arith.mulf %159, %5 : vector<8x8x32xf32>
    %161 = vector.extract_strided_slice %158 {offsets = [0, 0, 32], sizes = [8, 8, 32], strides = [1, 1, 1]} : vector<8x8x96xf32> to vector<8x8x32xf32>
    %162 = vector.extract_strided_slice %158 {offsets = [0, 0, 64], sizes = [8, 8, 32], strides = [1, 1, 1]} : vector<8x8x96xf32> to vector<8x8x32xf32>
    "tpu.trace_start"() <{level = 10 : i32, message = "gqe,gke->gqk"}> : () -> ()
    %cst_94 = arith.constant dense<0.000000e+00> : vector<8x8x8xf32>
    %163 = tpu.matmul %160, %161, %cst_94 {dimension_numbers = #tpu.dot_dimension_numbers<[2], [2], [1], [1], [0, 0, 0, 1, 1, 1], [0], [0]>} : vector<8x8x32xf32>, vector<8x8x32xf32>, vector<8x8x8xf32> -> vector<8x8x8xf32>
    "tpu.trace_stop"() : () -> ()
    %cst_95 = arith.constant dense<0xFF800000> : vector<8x8xf32>
    %164 = vector.multi_reduction <maximumf>, %163, %cst_95 [2] : vector<8x8x8xf32> to vector<8x8xf32>
    %165 = vector.shape_cast %164 : vector<8x8xf32> to vector<8x8x1xf32>
    %166 = vector.broadcast %165 : vector<8x8x1xf32> to vector<8x8x8xf32>
    %167 = arith.subf %163, %166 : vector<8x8x8xf32>
    %168 = math.exp %167 : vector<8x8x8xf32>
    %cst_96 = arith.constant dense<0.000000e+00> : vector<8x8xf32>
    %169 = vector.multi_reduction <add>, %168, %cst_96 [2] : vector<8x8x8xf32> to vector<8x8xf32>
    %170 = vector.shape_cast %169 : vector<8x8xf32> to vector<8x8x1xf32>
    %171 = vector.broadcast %170 : vector<8x8x1xf32> to vector<8x8x8xf32>
    %172 = arith.divf %168, %171 : vector<8x8x8xf32>
    "tpu.trace_start"() <{level = 10 : i32, message = "gqk,gke->gqe"}> : () -> ()
    %cst_97 = arith.constant dense<0.000000e+00> : vector<8x8x32xf32>
    %173 = tpu.matmul %172, %162, %cst_97 {dimension_numbers = #tpu.dot_dimension_numbers<[2], [1], [1], [2], [0, 0, 0, 1, 1, 2], [0], [0]>} : vector<8x8x8xf32>, vector<8x8x32xf32>, vector<8x8x32xf32> -> vector<8x8x32xf32>
    "tpu.trace_stop"() : () -> ()
    %174 = arith.mulf %173, %5 : vector<8x8x32xf32>
    %175 = vector.extract_strided_slice %174 {offsets = [0, 0, 0], sizes = [2, 8, 32], strides = [1, 1, 1]} : vector<8x8x32xf32> to vector<2x8x32xf32>
    %176 = vector.extract_strided_slice %174 {offsets = [2, 0, 0], sizes = [2, 8, 32], strides = [1, 1, 1]} : vector<8x8x32xf32> to vector<2x8x32xf32>
    %177 = arith.addf %175, %176 : vector<2x8x32xf32>
    %178 = vector.extract_strided_slice %174 {offsets = [4, 0, 0], sizes = [2, 8, 32], strides = [1, 1, 1]} : vector<8x8x32xf32> to vector<2x8x32xf32>
    %179 = arith.addf %177, %178 : vector<2x8x32xf32>
    %180 = vector.extract_strided_slice %174 {offsets = [6, 0, 0], sizes = [2, 8, 32], strides = [1, 1, 1]} : vector<8x8x32xf32> to vector<2x8x32xf32>
    %181 = arith.addf %179, %180 : vector<2x8x32xf32>
    %182 = vector.shape_cast %181 : vector<2x8x32xf32> to vector<16x32xf32>
    %cst_98 = arith.constant dense<0.000000e+00> : vector<16x32xf32>
    %183 = tpu.matmul %182, %133, %cst_98 {dimension_numbers = #tpu.dot_dimension_numbers<[1], [0], [0], [1], [0, 0, 1, 1], [], []>} : vector<16x32xf32>, vector<32x32xf32>, vector<16x32xf32> -> vector<16x32xf32>
    %184 = vector.broadcast %141 : vector<1x32xf32> to vector<16x32xf32>
    %185 = arith.addf %183, %184 : vector<16x32xf32>
    %186 = arith.addf %129, %185 : vector<16x32xf32>
    %cst_99 = arith.constant dense<0.000000e+00> : vector<16xf32>
    %187 = vector.multi_reduction <add>, %186, %cst_99 [1] : vector<16x32xf32> to vector<16xf32>
    %188 = vector.shape_cast %187 : vector<16xf32> to vector<16x1xf32>
    %cst_100 = arith.constant 3.200000e+01 : f32
    %189 = vector.broadcast %cst_100 : f32 to vector<16x1xf32>
    %190 = arith.divf %188, %189 : vector<16x1xf32>
    %191 = vector.broadcast %190 : vector<16x1xf32> to vector<16x32xf32>
    %192 = arith.subf %186, %191 : vector<16x32xf32>
    %193 = arith.mulf %192, %192 : vector<16x32xf32>
    %cst_101 = arith.constant dense<0.000000e+00> : vector<16xf32>
    %194 = vector.multi_reduction <add>, %193, %cst_101 [1] : vector<16x32xf32> to vector<16xf32>
    %195 = vector.shape_cast %194 : vector<16xf32> to vector<16x1xf32>
    %cst_102 = arith.constant 3.200000e+01 : f32
    %196 = vector.broadcast %cst_102 : f32 to vector<16x1xf32>
    %197 = arith.divf %195, %196 : vector<16x1xf32>
    %198 = vector.broadcast %190 : vector<16x1xf32> to vector<16x32xf32>
    %199 = arith.subf %186, %198 : vector<16x32xf32>
    %cst_103 = arith.constant 9.99999974E-6 : f32
    %200 = vector.broadcast %cst_103 : f32 to vector<16x1xf32>
    %201 = arith.addf %197, %200 : vector<16x1xf32>
    %202 = math.rsqrt %201 : vector<16x1xf32>
    %203 = vector.broadcast %202 : vector<16x1xf32> to vector<16x32xf32>
    %204 = arith.mulf %199, %203 : vector<16x32xf32>
    %205 = vector.broadcast %143 : vector<1x32xf32> to vector<16x32xf32>
    %206 = arith.mulf %204, %205 : vector<16x32xf32>
    %207 = vector.broadcast %145 : vector<1x32xf32> to vector<16x32xf32>
    %208 = arith.addf %206, %207 : vector<16x32xf32>
    %cst_104 = arith.constant dense<0.000000e+00> : vector<16x64xf32>
    %209 = tpu.matmul %208, %135, %cst_104 {dimension_numbers = #tpu.dot_dimension_numbers<[1], [0], [0], [1], [0, 0, 1, 1], [], []>} : vector<16x32xf32>, vector<32x64xf32>, vector<16x64xf32> -> vector<16x64xf32>
    %210 = vector.broadcast %147 : vector<1x64xf32> to vector<16x64xf32>
    %211 = arith.addf %209, %210 : vector<16x64xf32>
    %cst_105 = arith.constant 5.000000e-01 : f32
    %212 = vector.broadcast %cst_105 : f32 to vector<16x64xf32>
    %213 = arith.mulf %212, %211 : vector<16x64xf32>
    %cst_106 = arith.constant 0.707106769 : f32
    %214 = vector.broadcast %cst_106 : f32 to vector<16x64xf32>
    %215 = arith.mulf %211, %214 : vector<16x64xf32>
    %216 = math.erf %215 : vector<16x64xf32>
    %cst_107 = arith.constant 1.000000e+00 : f32
    %217 = vector.broadcast %cst_107 : f32 to vector<16x64xf32>
    %218 = arith.addf %217, %216 : vector<16x64xf32>
    %219 = arith.mulf %213, %218 : vector<16x64xf32>
    %cst_108 = arith.constant dense<0.000000e+00> : vector<16x32xf32>
    %220 = tpu.matmul %219, %137, %cst_108 {dimension_numbers = #tpu.dot_dimension_numbers<[1], [0], [0], [1], [0, 0, 1, 1], [], []>} : vector<16x64xf32>, vector<64x32xf32>, vector<16x32xf32> -> vector<16x32xf32>
    %221 = arith.addf %208, %220 : vector<16x32xf32>
    %222 = vector.broadcast %149 : vector<1x32xf32> to vector<16x32xf32>
    %223 = arith.addf %221, %222 : vector<16x32xf32>
    %cst_109 = arith.constant dense<0.000000e+00> : vector<16xf32>
    %224 = vector.multi_reduction <add>, %223, %cst_109 [1] : vector<16x32xf32> to vector<16xf32>
    %225 = vector.shape_cast %224 : vector<16xf32> to vector<16x1xf32>
    %cst_110 = arith.constant 3.200000e+01 : f32
    %226 = vector.broadcast %cst_110 : f32 to vector<16x1xf32>
    %227 = arith.divf %225, %226 : vector<16x1xf32>
    %228 = vector.broadcast %227 : vector<16x1xf32> to vector<16x32xf32>
    %229 = arith.subf %223, %228 : vector<16x32xf32>
    %230 = arith.mulf %229, %229 : vector<16x32xf32>
    %cst_111 = arith.constant dense<0.000000e+00> : vector<16xf32>
    %231 = vector.multi_reduction <add>, %230, %cst_111 [1] : vector<16x32xf32> to vector<16xf32>
    %232 = vector.shape_cast %231 : vector<16xf32> to vector<16x1xf32>
    %cst_112 = arith.constant 3.200000e+01 : f32
    %233 = vector.broadcast %cst_112 : f32 to vector<16x1xf32>
    %234 = arith.divf %232, %233 : vector<16x1xf32>
    %235 = vector.broadcast %227 : vector<16x1xf32> to vector<16x32xf32>
    %236 = arith.subf %223, %235 : vector<16x32xf32>
    %cst_113 = arith.constant 9.99999974E-6 : f32
    %237 = vector.broadcast %cst_113 : f32 to vector<16x1xf32>
    %238 = arith.addf %234, %237 : vector<16x1xf32>
    %239 = math.rsqrt %238 : vector<16x1xf32>
    %240 = vector.broadcast %239 : vector<16x1xf32> to vector<16x32xf32>
    %241 = arith.mulf %236, %240 : vector<16x32xf32>
    %242 = vector.broadcast %151 : vector<1x32xf32> to vector<16x32xf32>
    %243 = arith.mulf %241, %242 : vector<16x32xf32>
    %244 = vector.broadcast %153 : vector<1x32xf32> to vector<16x32xf32>
    %245 = arith.addf %243, %244 : vector<16x32xf32>
    %cst_114 = arith.constant dense<0.000000e+00> : vector<2x32xf32>
    %246 = tpu.matmul %6, %245, %cst_114 {dimension_numbers = #tpu.dot_dimension_numbers<[1], [0], [0], [1], [0, 0, 1, 1], [], []>} : vector<2x16xf32>, vector<16x32xf32>, vector<2x32xf32> -> vector<2x32xf32>
    %247 = vector.broadcast %1 : vector<1x32xf32> to vector<2x32xf32>
    %248 = arith.mulf %246, %247 : vector<2x32xf32>
    %cst_115 = arith.constant dense<0.000000e+00> : vector<2xf32>
    %249 = vector.multi_reduction <add>, %248, %cst_115 [1] : vector<2x32xf32> to vector<2xf32>
    %250 = vector.shape_cast %249 : vector<2xf32> to vector<2x1xf32>
    %251 = vector.broadcast %2 : vector<1x1xf32> to vector<2x1xf32>
    %252 = arith.addf %250, %251 : vector<2x1xf32>
    %c0_116 = arith.constant 0 : index
    %c0_117 = arith.constant 0 : index
    %253 = vector.load %arg5[%c0_116, %c0_117] : memref<2x1xf32, #tpu.memory_space<vmem>>, vector<2x1xf32>
    tpu.vector_store %arg5[%c0_116, %c0_117], %252 {strides = array<i32>} : memref<2x1xf32, #tpu.memory_space<vmem>>, vector<2x1xf32>,
    return
  }
  func.func @transform_0(%arg0: i32) -> (i32, i32) {
    %c0_i32 = arith.constant 0 : i32
    %c0_i32_0 = arith.constant 0 : i32
    %c0_i32_1 = arith.constant 0 : i32
    return %c0_i32, %c0_i32_0 : i32, i32
  }
  func.func @transform_1(%arg0: i32) -> (i32, i32) {
    %c0_i32 = arith.constant 0 : i32
    %c0_i32_0 = arith.constant 0 : i32
    %c0_i32_1 = arith.constant 0 : i32
    return %c0_i32, %c0_i32_0 : i32, i32
  }
  func.func @transform_2(%arg0: i32) -> (i32, i32, i32) {
    %c0_i32 = arith.constant 0 : i32
    %c0_i32_0 = arith.constant 0 : i32
    %c0_i32_1 = arith.constant 0 : i32
    %c0_i32_2 = arith.constant 0 : i32
    return %c0_i32, %c0_i32_0, %c0_i32_1 : i32, i32, i32
  }
  func.func @transform_3(%arg0: i32) -> (i32, i32, i32) {
    %c0_i32 = arith.constant 0 : i32
    %c0_i32_0 = arith.constant 0 : i32
    %c0_i32_1 = arith.constant 0 : i32
    %c0_i32_2 = arith.constant 0 : i32
    return %c0_i32, %c0_i32_0, %c0_i32_1 : i32, i32, i32
  }
  func.func @transform_4(%arg0: i32) -> (i32, i32) {
    %c0_i32 = arith.constant 0 : i32
    %c0_i32_0 = arith.constant 0 : i32
    %c0_i32_1 = arith.constant 0 : i32
    return %c0_i32, %c0_i32_0 : i32, i32
  }
}

</mosaic_0001>

<bundles_post_ra>
// kernel: tile.8
= control target key start
LH: loop header
LB: loop body
LE: loop exit
PB: predicated region body
PF: predicated region fallthrough
CT: control target
= control target key end

     0   :  { %s22_s0 = inlined_call_operand.vmem [shape: f32[8], index: 0, kind: input, shape index: {}]   ;;  %s23_s1 = inlined_call_operand.vmem [shape: f32[4,8], index: 1, kind: output, shape index: {}]  }
   0x1   :  { %v4_v0 = vld [vmem:[%s22_s0] ss:$0 sm:$0xff] }
   0x2   :  { %5 = vst [vmem:[%s23_s1] sm:$0xf] %v4_v0 }

// kernel: model_forward.1
= control target key start
LH: loop header
LB: loop body
LE: loop exit
PB: predicated region body
PF: predicated region fallthrough
CT: control target
= control target key end

     0   :  { %vm39_vm0 = vcmask 1043456   ;;  %vm32_vm1 = vcmask 31744   ;;  %vm141_vm2 = vcmask 261120   ;;  %v4538_v15 = vmov 0.0   ;;  %s4540_s6 = smov 96   ;;  %s4541_s23 = smov 64   ;;  %s5132_s1 = inlined_call_operand.vmem [shape: f32[82,32], index: 1, kind: input, shape index: {}]   ;;  %s5133_s0 = inlined_call_operand.vmem [shape: f32[16,4], index: 0, kind: input, shape index: {}]   ;;  %s5134_s2 = inlined_call_operand.vmem [shape: f32[2,64,224], index: 2, kind: input, shape index: {}]   ;;  %s5135_s3 = inlined_call_operand.vmem [shape: f32[2,1,352], index: 3, kind: input, shape index: {}]   ;;  %s5136_s4 = inlined_call_operand.vmem [shape: f32[2,1], index: 4, kind: output, shape index: {}]  }
   0x1   :  { %v17_v0 = vld [vmem:[%s5132_s1] sm:$0xf]  ;;  %v31_v2 = vld [vmem:[%s5133_s0 + $0x8] sm:$0xff]  ;;  %v4586_v4 = vld [vmem:[%s5134_s2 + $0x10] sm:$0xff]  ;;  %vm4539_vm3 = vmmov 0   ;;  %vm825_vm4 = vcmask 64512  }
   0x2   :  { %v30_v1 = vld [vmem:[%s5133_s0] sm:$0xff]  ;;  %4017 = vmatprep.subr.msk.mxu0 %vm39_vm0, %v17_v0  ;;  %v4600_v8 = vld [vmem:[%s5134_s2 + $0x30] sm:$0xff]  ;;  %v20_v10 = vld [vmem:[%s5132_s1 + $0x8] sm:$0xff]  ;;  %s4542_s24 = smov 32   ;;  %vm1786_vm5 = vcmask 523264   ;;  %vm3706_vm6 = vcmask 130048  }
   0x3   :  { %4019 = vmatprep.mubr.msk.f32.mxu0 %vm32_vm1, %v30_v1  ;;  %v4581_v3 = vld [vmem:[%s5134_s2] sm:$0xff]  ;;  %4018 = vmatpush3.msk.msra.mxu0 %vm39_vm0, %v17_v0  ;;  %v4639_v21 = vld [vmem:[%s5132_s1 + $0x10] sm:$0xff]  ;;  %v4657_v26 = vld [vmem:[%s5132_s1 + $0x18] sm:$0xff]  ;;  %vm3785_vm7 = vcmask 254976   ;;  %vm3794_vm8 = vcmask 1024  }
   0x4   :  { %v4382_v5 = vpack.i.bf16 %v4586_v4, %v4581_v3  ;;  %v4293_v6 = vpack.c.bf16 %v4586_v4, %v4581_v3  ;;  %4020 = vmatmul.mubr.msk.f32.vlgmr.msra.gmra.mrb[0].mxu0 %vm32_vm1, %v31_v2  ;;  %v4595_v7 = vld [vmem:[%s5134_s2 + $0x20] sm:$0xff]  ;;  %4033 = vmatprep.subr.mxu0 %v4538_v15  ;;  %v4644_v22 = vld [vmem:[%s5132_s1 + $0x30] sm:$0xff]  ;;  %v4696_v33 = vld [vmem:[%s5132_s1 + $0x28] sm:$0xff] }
   0x5   :  { %v4297_v9 = vpack.c.bf16 %v4600_v8, %v4595_v7  ;;  %4035 = vmatprep.mubr.msk.f32.mxu0 %vm4539_vm3, %v4538_v15  ;;  %v4624_v16 = vld [vmem:[%s5135_s3] ss:$0 sm:$0xff]  ;;  %v4708_v35 = vld [vmem:[%s5132_s1 + $0x38] sm:$0xff]  ;;  %v4720_v37 = vld [vmem:[%s5132_s1 + $0x48] sm:$0xff] }
   0x6   :  { %4294 = vmatprep.subr.bf16.mxu1 %v4293_v6  ;;  %v4662_v27 = vld [vmem:[%s5132_s1 + $0x40] sm:$0xff] }
   0x7   :  { %4296 = vmatpush3.bf16.msra.mxu1 %v4293_v6  ;;  %v4680_v31 = vld [vmem:[%s5132_s1 + $0x20] sm:$0xff] }
   0x8   :  { %4298 = vmatprep.subr.bf16.mxu1 %v4297_v9 }
   0xb   :  { %4300 = vmatpush3.bf16.msra.mxu1 %v4297_v9 }
   0xc   :  { %4053 = vmatprep.subr.mxu1 %v4538_v15 }
  0xd7   :  { %v4021_v11 = vpop.f32.mrb[0].mxu0 }
  0xd8   :  { %v109_v12 = vpop.f32.mrb[1].mxu0  ;;  %v4609_v14 = vadd.f32 %v4021_v11, %v20_v10 }
  0xd9   :  { %v4607_v13 = vadd.f32 %v109_v12, %v20_v10 }
  0xdb   :  { %4030 = vmatprep.mubr.msk.f32.mxu1 %vm141_vm2, %v4607_v13 }
  0xdc   :  { %4031 = vmatmul.mubr.msk.f32.vlgmr.msra.gmra.mrb[0].mxu1 %vm141_vm2, %v4609_v14 }
  0xdd   :  { %4055 = vmatprep.mubr.msk.f32.mxu1 %vm4539_vm3, %v4538_v15 }
 0x1af   :  { %v4032_v17 = vpop.f32.mrb[0].mxu1 }
 0x1b0   :  { %v214_v18 = vpop.f32.mrb[1].mxu1  ;;  %v4632_v20 = vadd.f32 %v4032_v17, %v4624_v16 }
 0x1b1   :  { %v4627_v19 = vadd.f32 %v4624_v16, %v214_v18 }
 0x1b2   :  { %v224_v29 = vmul.f32 %v4632_v20, %v4657_v26  ;;  %v226_v34 = vmul.f32 %v4632_v20, %v4696_v33  ;;  %v228_v36 = vmul.f32 %v4632_v20, %v4708_v35  ;;  %v230_v38 = vmul.f32 %v4632_v20, %v4720_v37 }
 0x1b3   :  { %232 = vrot.lane.b32.xlu0 %v4627_v19, %s4540_s6  ;;  %v223_v24 = vmul.f32 %v4627_v19, %v4639_v21  ;;  %v227_v25 = vmul.f32 %v4627_v19, %v4644_v22  ;;  %v229_v30 = vmul.f32 %v4627_v19, %v4662_v27  ;;  %v225_v32 = vmul.f32 %v4627_v19, %v4680_v31 }
 0x1b7   :  { %310 = vrot.lane.b32.xlu0 %v4632_v20, %s4540_s6 }
 0x225   :  { %v233_v23 = vpop.permute.xlu0 %232 }
 0x226   :  { %4034 = vmatpush3.xpose.msk.msra.mxu0 %vm141_vm2, %v233_v23  ;;  %4054 = vmatpush3.xpose.msk.msra.mxu1 %vm141_vm2, %v233_v23 }
 0x227   :  { %4038 = vmatprep.subr.mxu0 %v4538_v15  ;;  %4063 = vmatprep.subr.mxu1 %v4538_v15 }
 0x229   :  { %v311_v28 = vpop.permute.xlu0 %310  ;;  %4036 = vmatmul.mubr.msk.f32.vlgmr.msra.gmra.mrb[2].mxu0 %vm141_vm2, %v223_v24  ;;  %4056 = vmatmul.mubr.msk.f32.vlgmr.msra.gmra.mrb[2].mxu1 %vm141_vm2, %v227_v25 }
 0x22a   :  { %4039 = vmatpush3.xpose.msk.msra.mxu0 %vm141_vm2, %v311_v28  ;;  %4064 = vmatpush3.xpose.msk.msra.mxu1 %vm141_vm2, %v233_v23 }
 0x22b   :  { %4040 = vmatprep.mubr.msk.f32.mxu0 %vm4539_vm3, %v4538_v15  ;;  %4065 = vmatprep.mubr.msk.f32.mxu1 %vm4539_vm3, %v4538_v15 }
 0x22c   :  { %4043 = vmatprep.subr.mxu0 %v4538_v15  ;;  %4073 = vmatprep.subr.mxu1 %v4538_v15 }
 0x22d   :  { %4041 = vmatmul.mubr.msk.f32.vlgmr.msra.gmra.mrb[4].mxu0 %vm141_vm2, %v224_v29  ;;  %4066 = vmatmul.mubr.msk.f32.vlgmr.msra.gmra.mrb[4].mxu1 %vm141_vm2, %v229_v30 }
 0x22e   :  { %4044 = vmatpush3.xpose.msk.msra.mxu0 %vm141_vm2, %v233_v23  ;;  %4045 = vmatprep.mubr.msk.f32.mxu0 %vm4539_vm3, %v4538_v15 }
 0x22f   :  { %4048 = vmatprep.subr.mxu0 %v4538_v15  ;;  %4075 = vmatprep.mubr.msk.f32.mxu1 %vm4539_vm3, %v4538_v15 }
 0x231   :  { %4046 = vmatmul.mubr.msk.f32.vlgmr.msra.gmra.mrb[6].mxu0 %vm141_vm2, %v225_v32 }
 0x232   :  { %4049 = vmatpush3.xpose.msk.msra.mxu0 %vm141_vm2, %v311_v28  ;;  %4050 = vmatprep.mubr.msk.f32.mxu0 %vm4539_vm3, %v4538_v15 }
 0x233   :  { %4058 = vmatprep.subr.mxu0 %v4538_v15 }
 0x235   :  { %4051 = vmatmul.mubr.msk.f32.vlgmr.msra.gmra.mrb[8].mxu0 %vm141_vm2, %v226_v34 }
 0x236   :  { %4059 = vmatpush3.xpose.msk.msra.mxu0 %vm141_vm2, %v311_v28  ;;  %4060 = vmatprep.mubr.msk.f32.mxu0 %vm4539_vm3, %v4538_v15 }
 0x237   :  { %4068 = vmatprep.subr.mxu0 %v4538_v15 }
 0x239   :  { %4061 = vmatmul.mubr.msk.f32.vlgmr.msra.gmra.mrb[10].mxu0 %vm141_vm2, %v228_v36 }
 0x23a   :  { %4069 = vmatpush3.xpose.msk.msra.mxu0 %vm141_vm2, %v311_v28  ;;  %4070 = vmatprep.mubr.msk.f32.mxu0 %vm4539_vm3, %v4538_v15 }
 0x23b   :  { %4078 = vmatprep.subr.mxu0 %v4538_v15 }
 0x23d   :  { %4071 = vmatmul.mubr.msk.f32.vlgmr.msra.gmra.mrb[12].mxu0 %vm141_vm2, %v230_v38 }
 0x23e   :  { %4080 = vmatprep.mubr.msk.f32.mxu0 %vm4539_vm3, %v4538_v15 }
 0x2fc   :  { %v305_v39 = vpop.f32.mrb[2].mxu0  ;;  %v602_v40 = vpop.f32.mrb[2].mxu1 }
 0x2fd   :  { %v4037_v41 = vpop.f32.mrb[3].mxu0  ;;  %v4057_v42 = vpop.f32.mrb[3].mxu1  ;;  %v826_v43 = vsel %vm825_vm4, %v305_v39, -inf  ;;  %v838_v51 = vsel %vm825_vm4, %v602_v40, -inf }
 0x2fe   :  { %827 = vmax.xlane.f32.xlu1 %v826_v43 }
 0x300   :  { %v383_v44 = vpop.f32.mrb[4].mxu0  ;;  %v748_v45 = vpop.f32.mrb[4].mxu1 }
 0x301   :  { %v4042_v46 = vpop.f32.mrb[5].mxu0  ;;  %v4067_v47 = vpop.f32.mrb[5].mxu1  ;;  %v829_v48 = vsel %vm825_vm4, %v383_v44, -inf  ;;  %v844_v55 = vsel %vm825_vm4, %v748_v45, -inf }
 0x302   :  { %830 = vmax.xlane.f32.xlu1 %v829_v48 }
 0x304   :  { %v456_v49 = vpop.f32.mrb[6].mxu0 }
 0x305   :  { %v4047_v50 = vpop.f32.mrb[7].mxu0  ;;  %v832_v52 = vsel %vm825_vm4, %v456_v49, -inf }
 0x306   :  { %839 = vmax.xlane.f32.xlu1 %v838_v51  ;;  %833 = vmax.xlane.f32.xlu0 %v832_v52 }
 0x308   :  { %v529_v53 = vpop.f32.mrb[8].mxu0 }
 0x309   :  { %v4052_v54 = vpop.f32.mrb[9].mxu0  ;;  %v835_v58 = vsel %vm825_vm4, %v529_v53, -inf }
 0x30a   :  { %845 = vmax.xlane.f32.xlu1 %v844_v55 }
 0x30c   :  { %v675_v56 = vpop.f32.mrb[10].mxu0 }
 0x30d   :  { %v4062_v57 = vpop.f32.mrb[11].mxu0  ;;  %v841_v61 = vsel %vm825_vm4, %v675_v56, -inf }
 0x30e   :  { %836 = vmax.xlane.f32.xlu1 %v835_v58  ;;  %v4387_v58 = vpack.i.bf16 %v4600_v8, %v4595_v7 }
 0x310   :  { %v821_v59 = vpop.f32.mrb[12].mxu0 }
 0x311   :  { %v4072_v60 = vpop.f32.mrb[13].mxu0  ;;  %v847_v62 = vsel %vm825_vm4, %v821_v59, -inf }
 0x312   :  { %842 = vmax.xlane.f32.xlu1 %v841_v61 }
 0x316   :  { %848 = vmax.xlane.f32.xlu1 %v847_v62 }
 0x38b   :  { %v828_v63 = vpop.xlane.xlu1 %827 }
 0x38c   :  { %v850_v0 = vsub.f32 %v305_v39, %v828_v63 }
 0x38e   :  { %v858_v1 = vmul.f32 1.442695, %v850_v0 }
 0x38f   :  { %v831_v2 = vpop.xlane.xlu1 %830 }
 0x390   :  { %4442 = vpow2.f32 %v858_v1  ;;  %v851_v6 = vsub.f32 %v383_v44, %v831_v2 }
 0x392   :  { %v860_v11 = vmul.f32 1.442695, %v851_v6 }
 0x393   :  { %v840_v9 = vpop.xlane.xlu1 %839  ;;  %v834_v17 = vpop.xlane.xlu0 %833 }
 0x394   :  { %v854_v10 = vsub.f32 %v602_v40, %v840_v9  ;;  %v852_v25 = vsub.f32 %v456_v49, %v834_v17 }
 0x396   :  { %v866_v12 = vmul.f32 1.442695, %v854_v10  ;;  %v862_v34 = vmul.f32 1.442695, %v852_v25 }
 0x397   :  { %v846_v18 = vpop.xlane.xlu1 %845 }
 0x398   :  { %4444 = vpow2.f32 %v866_v12  ;;  %v856_v23 = vsub.f32 %v748_v45, %v846_v18 }
 0x399   :  { %4446 = vpow2.f32 %v860_v11 }
 0x39a   :  { %v4740_v24 = vpop.eup %4442  ;;  %v870_v28 = vmul.f32 1.442695, %v856_v23 }
 0x39b   :  { %v837_v29 = vpop.xlane.xlu1 %836  ;;  %v874_v30 = vsel %vm825_vm4, %v4740_v24, 0.0 }
 0x39c   :  { %v853_v32 = vsub.f32 %v529_v53, %v837_v29  ;;  %875 = vadd.xlane.f32.xlu1 %v874_v30  ;;  %4448 = vpow2.f32 %v870_v28 }
 0x39e   :  { %v864_v36 = vmul.f32 1.442695, %v853_v32 }
 0x39f   :  { %v843_v38 = vpop.xlane.xlu1 %842 }
 0x3a0   :  { %4450 = vpow2.f32 %v864_v36  ;;  %v855_v39 = vsub.f32 %v675_v56, %v843_v38 }
 0x3a1   :  { %4452 = vpow2.f32 %v862_v34 }
 0x3a2   :  { %v4744_v40 = vpop.eup %4444  ;;  %v868_v41 = vmul.f32 1.442695, %v855_v39 }
 0x3a3   :  { %v849_v42 = vpop.xlane.xlu1 %848  ;;  %v886_v43 = vsel %vm825_vm4, %v4744_v40, 0.0  ;;  %v4447_v44 = vpop.eup %4446 }
 0x3a4   :  { %4454 = vpow2.f32 %v868_v41  ;;  %v857_v45 = vsub.f32 %v821_v59, %v849_v42  ;;  %887 = vadd.xlane.f32.xlu1 %v886_v43  ;;  %v877_v47 = vsel %vm825_vm4, %v4447_v44, 0.0 }
 0x3a6   :  { %v872_v46 = vmul.f32 1.442695, %v857_v45  ;;  %v4749_v48 = vpop.eup %4448 }
 0x3a7   :  { %v892_v51 = vsel %vm825_vm4, %v4749_v48, 0.0 }
 0x3a8   :  { %4456 = vpow2.f32 %v872_v46  ;;  %878 = vadd.xlane.f32.xlu1 %v877_v47 }
 0x3aa   :  { %v4451_v49 = vpop.eup %4450 }
 0x3ab   :  { %v883_v50 = vsel %vm825_vm4, %v4451_v49, 0.0  ;;  %v4453_v52 = vpop.eup %4452 }
 0x3ac   :  { %884 = vadd.xlane.f32.xlu0 %v883_v50  ;;  %893 = vadd.xlane.f32.xlu1 %v892_v51  ;;  %v880_v55 = vsel %vm825_vm4, %v4453_v52, 0.0 }
 0x3ae   :  { %v4455_v53 = vpop.eup %4454 }
 0x3af   :  { %v889_v54 = vsel %vm825_vm4, %v4455_v53, 0.0 }
 0x3b0   :  { %890 = vadd.xlane.f32.xlu0 %v889_v54  ;;  %881 = vadd.xlane.f32.xlu1 %v880_v55 }
 0x3b2   :  { %v4756_v56 = vpop.eup %4456 }
 0x3b3   :  { %v895_v57 = vsel %vm825_vm4, %v4756_v56, 0.0 }
 0x3b4   :  { %896 = vadd.xlane.f32.xlu0 %v895_v57 }
 0x3c1   :  { %914 = vrot.lane.b32.xlu1 %v4627_v19, %s4541_s23 }
 0x3c5   :  { %4383 = vrot.lane.b32.xlu1 %v4382_v5, %s4542_s24 }
 0x3c9   :  { %4388 = vrot.lane.b32.xlu1 %v4387_v58, %s4542_s24 }
 0x3ca   :  { %990 = vrot.lane.b32.xlu0 %v4632_v20, %s4541_s23 }
 0x3ce   :  { %1534 = vrot.lane.b32.xlu0 %v4624_v16, %s4542_s24 }
 0x429   :  { %v876_v59 = vpop.xlane.xlu1 %875 }
 0x42a   :  { %4458 = vrcp.f32 %v876_v59 }
 0x431   :  { %v888_v60 = vpop.xlane.xlu1 %887 }
 0x434   :  { %v4459_v3 = vpop.eup %4458 }
 0x435   :  { %v879_v19 = vpop.xlane.xlu1 %878  ;;  %v899_v4 = vmul.f32 %v4459_v3, %v4740_v24 }
 0x436   :  { %4460 = vrcp.f32 %v879_v19 }
 0x439   :  { %v885_v20 = vpop.xlane.xlu0 %884  ;;  %v894_v61 = vpop.xlane.xlu1 %893 }
 0x43a   :  { %4462 = vrcp.f32 %v885_v20 }
 0x43d   :  { %v891_v62 = vpop.xlane.xlu0 %890  ;;  %v882_v63 = vpop.xlane.xlu1 %881 }
 0x43e   :  { %4464 = vrcp.f32 %v882_v63 }
 0x43f   :  { %4466 = vrcp.f32 %v891_v62 }
 0x440   :  { %4468 = vrcp.f32 %v888_v60  ;;  %v4461_v8 = vpop.eup %4460 }
 0x441   :  { %v897_v5 = vpop.xlane.xlu0 %896  ;;  %v915_v7 = vpop.permute.xlu1 %914  ;;  %v901_v16 = vmul.f32 %v4461_v8, %v4447_v44 }
 0x442   :  { %4074 = vmatpush3.msra.mxu1 %v915_v7  ;;  %4470 = vrcp.f32 %v897_v5 }
 0x443   :  { %4076 = vmatmul.mubr.msk.f32.vlgmr.msra.gmra.mrb[6].mxu1 %vm825_vm4, %v899_v4  ;;  %4083 = vmatprep.subr.mxu1 %v4538_v15  ;;  %4472 = vrcp.f32 %v894_v61 }
 0x444   :  { %4084 = vmatpush3.msra.mxu1 %v915_v7  ;;  %4085 = vmatprep.mubr.msk.f32.mxu1 %vm4539_vm3, %v4538_v15  ;;  %v4463_v1 = vpop.eup %4462 }
 0x445   :  { %v991_v0 = vpop.permute.xlu0 %990  ;;  %4093 = vmatprep.subr.mxu1 %v4538_v15  ;;  %v905_v6 = vmul.f32 %v4463_v1, %v4451_v49  ;;  %v4384_v28 = vpop.permute.xlu1 %4383 }
 0x446   :  { %4079 = vmatpush3.msra.mxu0 %v991_v0  ;;  %v4386_v29 = vunpack.i.h.bf16 %v4384_v28  ;;  %v4385_v30 = vunpack.i.l.bf16 %v4384_v28 }
 0x447   :  { %4081 = vmatmul.mubr.msk.f32.vlgmr.msra.gmra.mrb[14].mxu0 %vm825_vm4, %v901_v16  ;;  %4088 = vmatprep.subr.mxu0 %v4538_v15 }
 0x448   :  { %4089 = vmatpush3.msra.mxu0 %v991_v0  ;;  %4090 = vmatprep.mubr.msk.f32.mxu0 %vm4539_vm3, %v4538_v15  ;;  %v4465_v2 = vpop.eup %4464  ;;  %v4301_v32 = vpack.c.bf16 %v4386_v29, %v4385_v30 }
 0x449   :  { %4098 = vmatprep.subr.mxu0 %v4538_v15  ;;  %v4467_v9 = vpop.eup %4466  ;;  %v903_v10 = vmul.f32 %v4465_v2, %v4453_v52  ;;  %v4389_v34 = vpop.permute.xlu1 %4388 }
 0x44a   :  { %v4469_v11 = vpop.eup %4468  ;;  %v909_v12 = vmul.f32 %v4467_v9, %v4455_v53  ;;  %v4391_v36 = vunpack.i.h.bf16 %v4389_v34  ;;  %v4390_v38 = vunpack.i.l.bf16 %v4389_v34  ;;  %v1535_v8 = vpop.permute.xlu0 %1534  ;;  %v125_v34 = vld [vmem:[%s5134_s2 + $0x18] sm:$0xff] }
 0x44b   :  { %4091 = vmatmul.mubr.msk.f32.vlgmr.msra.gmra.mrb[16].mxu0 %vm825_vm4, %v905_v6  ;;  %4086 = vmatmul.mubr.msk.f32.vlgmr.msra.gmra.mrb[8].mxu1 %vm825_vm4, %v903_v10  ;;  %v907_v18 = vmul.f32 %v4469_v11, %v4744_v40 }
 0x44c   :  { %4099 = vmatpush3.msra.mxu0 %v991_v0  ;;  %4094 = vmatpush3.msra.mxu1 %v915_v7  ;;  %v4471_v17 = vpop.eup %4470  ;;  %v4305_v39 = vpack.c.bf16 %v4391_v36, %v4390_v38  ;;  %v126_v38 = vld [vmem:[%s5134_s2 + $0x28] sm:$0xff] }
 0x44d   :  { %4095 = vmatprep.mubr.msk.f32.mxu1 %vm4539_vm3, %v4538_v15  ;;  %4100 = vmatprep.mubr.msk.f32.mxu0 %vm4539_vm3, %v4538_v15  ;;  %v4473_v23 = vpop.eup %4472  ;;  %v913_v24 = vmul.f32 %v4471_v17, %v4756_v56 }
 0x44e   :  { %4103 = vmatprep.subr.mxu1 %v4538_v15  ;;  %4108 = vmatprep.subr.mxu0 %v4538_v15  ;;  %v911_v25 = vmul.f32 %v4473_v23, %v4749_v48 }
 0x44f   :  { %4101 = vmatmul.mubr.msk.f32.vlgmr.msra.gmra.mrb[18].mxu0 %vm825_vm4, %v909_v12  ;;  %4096 = vmatmul.mubr.msk.f32.vlgmr.msra.gmra.mrb[10].mxu1 %vm825_vm4, %v907_v18 }
 0x450   :  { %4109 = vmatpush3.msra.mxu0 %v991_v0  ;;  %4104 = vmatpush3.msra.mxu1 %v915_v7 }
 0x451   :  { %4105 = vmatprep.mubr.msk.f32.mxu1 %vm4539_vm3, %v4538_v15  ;;  %4110 = vmatprep.mubr.msk.f32.mxu0 %vm4539_vm3, %v4538_v15 }
 0x452   :  { %4302 = vmatprep.subr.bf16.mxu1 %v4301_v32 }
 0x453   :  { %4111 = vmatmul.mubr.msk.f32.vlgmr.msra.gmra.mrb[20].mxu0 %vm825_vm4, %v913_v24  ;;  %4106 = vmatmul.mubr.msk.f32.vlgmr.msra.gmra.mrb[12].mxu1 %vm825_vm4, %v911_v25 }
 0x454   :  { %4304 = vmatpush3.bf16.msra.mxu1 %v4301_v32  ;;  %v124_v32 = vld [vmem:[%s5134_s2 + $0x8] sm:$0xff] }
 0x455   :  { %4306 = vmatprep.subr.bf16.mxu1 %v4305_v39  ;;  %v4309_v36 = vpack.c.bf16 %v125_v34, %v124_v32 }
 0x457   :  { %4310 = vmatprep.subr.bf16.mxu0 %v4309_v36 }
 0x458   :  { %4308 = vmatpush3.bf16.msra.mxu1 %v4305_v39  ;;  %4312 = vmatpush3.bf16.msra.mxu0 %v4309_v36  ;;  %v127_v39 = vld [vmem:[%s5134_s2 + $0x38] sm:$0xff] }
 0x516   :  { %v986_v40 = vpop.f32.mrb[6].mxu1 }
 0x517   :  { %v4077_v41 = vpop.f32.mrb[7].mxu1  ;;  %v1504_v49 = vmul.f32 %v986_v40, %v4639_v21  ;;  %v4313_v40 = vpack.c.bf16 %v127_v39, %v126_v38 }
 0x518   :  { %v4392_v41 = vpack.i.bf16 %v125_v34, %v124_v32 }
 0x519   :  { %4314 = vmatprep.subr.bf16.mxu0 %v4313_v40 }
 0x51a   :  { %v1062_v42 = vpop.f32.mrb[14].mxu0  ;;  %4316 = vmatpush3.bf16.msra.mxu0 %v4313_v40 }
 0x51b   :  { %v4082_v43 = vpop.f32.mrb[15].mxu0  ;;  %v1505_v45 = vmul.f32 %v1062_v42, %v4657_v26  ;;  %v4397_v42 = vpack.i.bf16 %v127_v39, %v126_v38 }
 0x51c   :  { %v128_v43 = vld [vmem:[%s5134_s2 + $0x48] sm:$0xff] }
 0x51e   :  { %v1208_v44 = vpop.f32.mrb[16].mxu0  ;;  %v1135_v46 = vpop.f32.mrb[8].mxu1 }
 0x51f   :  { %v1507_v47 = vmul.f32 %v1208_v44, %v4696_v33  ;;  %v4092_v48 = vpop.f32.mrb[17].mxu0  ;;  %v1506_v50 = vmul.f32 %v1135_v46, %v4680_v31  ;;  %v4087_v51 = vpop.f32.mrb[9].mxu1  ;;  %v129_v44 = vld [vmem:[%s5134_s2 + $0x58] sm:$0xff] }
 0x520   :  { %v131_v46 = vld [vmem:[%s5134_s2 + $0x78] sm:$0xff] }
 0x521   :  { %v1513_v52 = vadd.f32 %v1507_v47, %v1505_v45  ;;  %v1512_v53 = vadd.f32 %v1506_v50, %v1504_v49  ;;  %v130_v45 = vld [vmem:[%s5134_s2 + $0x68] sm:$0xff]  ;;  %v4402_v47 = vpack.i.bf16 %v129_v44, %v128_v43 }
 0x522   :  { %v1354_v54 = vpop.f32.mrb[18].mxu0  ;;  %v1281_v55 = vpop.f32.mrb[10].mxu1  ;;  %v4407_v48 = vpack.i.bf16 %v131_v46, %v130_v45 }
 0x523   :  { %v1509_v56 = vmul.f32 %v1354_v54, %v4708_v35  ;;  %v4102_v57 = vpop.f32.mrb[19].mxu0  ;;  %v1508_v58 = vmul.f32 %v1281_v55, %v4644_v22  ;;  %v4097_v59 = vpop.f32.mrb[11].mxu1 }
 0x525   :  { %v1515_v60 = vadd.f32 %v1513_v52, %v1509_v56  ;;  %v1514_v19 = vadd.f32 %v1512_v53, %v1508_v58 }
 0x526   :  { %v1500_v20 = vpop.f32.mrb[20].mxu0  ;;  %v1427_v61 = vpop.f32.mrb[12].mxu1 }
 0x527   :  { %v1511_v62 = vmul.f32 %v1500_v20, %v4720_v37  ;;  %v4112_v63 = vpop.f32.mrb[21].mxu0  ;;  %v1510_v3 = vmul.f32 %v1427_v61, %v4662_v27  ;;  %v4107_v4 = vpop.f32.mrb[13].mxu1 }
 0x529   :  { %v1517_v5 = vadd.f32 %v1515_v60, %v1511_v62  ;;  %v1516_v7 = vadd.f32 %v1514_v19, %v1510_v3 }
 0x52b   :  { %4121 = vmatprep.mubr.msk.f32.mxu1 %vm141_vm2, %v1516_v7 }
 0x52c   :  { %4122 = vmatmul.mubr.msk.f32.vlgmr.msra.gmra.mrb[14].mxu1 %vm141_vm2, %v1517_v5 }
 0x5ff   :  { %v4123_v16 = vpop.f32.mrb[14].mxu1 }
 0x600   :  { %v1615_v0 = vadd.f32 %v4123_v16, %v1535_v8  ;;  %v1609_v1 = vpop.f32.mrb[15].mxu1 }
 0x601   :  { %v1610_v2 = vadd.f32 %v1609_v1, %v1535_v8 }
 0x602   :  { %v1619_v6 = vadd.f32 %v1615_v0, %v4609_v14 }
 0x603   :  { %v1618_v9 = vadd.f32 %v1610_v2, %v4607_v13  ;;  %v3832_v13 = vld [vmem:[%s5135_s3 + $0x1] ss:$0 sm:$0xff] }
 0x604   :  { %v1623_v10 = vsel %vm141_vm2, %v1619_v6, 0.0 }
 0x605   :  { %1624 = vadd.xlane.f32.xlu0 %v1623_v10  ;;  %v1620_v11 = vsel %vm141_vm2, %v1618_v9, 0.0 }
 0x606   :  { %1621 = vadd.xlane.f32.xlu1 %v1620_v11 }
 0x692   :  { %v1625_v12 = vpop.xlane.xlu0 %1624 }
 0x693   :  { %v1628_v17 = vmul.f32 0.03125, %v1625_v12  ;;  %v1622_v18 = vpop.xlane.xlu1 %1621 }
 0x694   :  { %v1627_v23 = vmul.f32 0.03125, %v1622_v18 }
 0x695   :  { %v1630_v24 = vsub.f32 %v1619_v6, %v1628_v17 }
 0x696   :  { %v1629_v25 = vsub.f32 %v1618_v9, %v1627_v23 }
 0x697   :  { %v1632_v28 = vmul.f32 %v1630_v24, %v1630_v24 }
 0x698   :  { %v1631_v29 = vmul.f32 %v1629_v25, %v1629_v25 }
 0x699   :  { %v1636_v30 = vsel %vm141_vm2, %v1632_v28, 0.0 }
 0x69a   :  { %1637 = vadd.xlane.f32.xlu1 %v1636_v30  ;;  %v1633_v14 = vsel %vm141_vm2, %v1631_v29, 0.0 }
 0x69b   :  { %1634 = vadd.xlane.f32.xlu0 %v1633_v14 }
 0x6ab   :  { %1660 = vrot.lane.b32.xlu1 %v3832_v13, %s4541_s23 }
 0x6af   :  { %4393 = vrot.lane.b32.xlu1 %v4392_v41, %s4541_s23  ;;  %v3837_v41 = vld [vmem:[%s5135_s3 + $0x2] ss:$0 sm:$0xff] }
 0x6b1   :  { %1655 = vrot.lane.b32.xlu0 %v3832_v13, %s4540_s6 }
 0x6b3   :  { %4403 = vrot.lane.b32.xlu1 %v4402_v47, %s4541_s23 }
 0x6b5   :  { %4398 = vrot.lane.b32.xlu0 %v4397_v42, %s4541_s23 }
 0x6b9   :  { %4408 = vrot.lane.b32.xlu0 %v4407_v48, %s4541_s23 }
 0x727   :  { %v1638_v49 = vpop.xlane.xlu1 %1637 }
 0x728   :  { %v1640_v50 = vmul.f32 0.03125, %v1638_v49  ;;  %v1635_v51 = vpop.xlane.xlu0 %1634 }
 0x729   :  { %v1639_v52 = vmul.f32 0.03125, %v1635_v51 }
 0x72a   :  { %v1642_v53 = vadd.f32 1e-05, %v1640_v50 }
 0x72b   :  { %v1641_v54 = vadd.f32 1e-05, %v1639_v52  ;;  %v1661_v55 = vpop.permute.xlu1 %1660 }
 0x72c   :  { %4474 = vrsqrt.f32 %v1642_v53  ;;  %v1656_v62 = vpop.permute.xlu0 %1655 }
 0x72d   :  { %4476 = vrsqrt.f32 %v1641_v54 }
 0x72f   :  { %v4394_v56 = vpop.permute.xlu1 %4393 }
 0x730   :  { %v4396_v57 = vunpack.i.h.bf16 %v4394_v56  ;;  %v4395_v58 = vunpack.i.l.bf16 %v4394_v56  ;;  %v4399_v7 = vpop.permute.xlu0 %4398 }
 0x731   :  { %v4401_v8 = vunpack.i.h.bf16 %v4399_v7  ;;  %v4400_v16 = vunpack.i.l.bf16 %v4399_v7 }
 0x732   :  { %v4317_v60 = vpack.c.bf16 %v4396_v57, %v4395_v58 }
 0x733   :  { %v4321_v0 = vpack.c.bf16 %v4401_v8, %v4400_v16  ;;  %v4404_v1 = vpop.permute.xlu1 %4403 }
 0x734   :  { %4318 = vmatprep.subr.bf16.mxu1 %v4317_v60  ;;  %v4406_v2 = vunpack.i.h.bf16 %v4404_v1  ;;  %v4405_v6 = vunpack.i.l.bf16 %v4404_v1  ;;  %v4409_v10 = vpop.permute.xlu0 %4408 }
 0x735   :  { %4320 = vmatpush3.bf16.msra.mxu1 %v4317_v60  ;;  %v4411_v11 = vunpack.i.h.bf16 %v4409_v10  ;;  %v4410_v12 = vunpack.i.l.bf16 %v4409_v10  ;;  %v4875_v60 = vld [vmem:[%s5134_s2 + $0x90] sm:$0xff] }
 0x736   :  { %v4475_v59 = vpop.eup %4474  ;;  %4322 = vmatprep.subr.bf16.mxu1 %v4321_v0  ;;  %v4325_v9 = vpack.c.bf16 %v4406_v2, %v4405_v6 }
 0x737   :  { %v4477_v19 = vpop.eup %4476  ;;  %v1646_v20 = vmul.f32 %v4475_v59, %v1630_v24  ;;  %v4329_v17 = vpack.c.bf16 %v4411_v11, %v4410_v12  ;;  %v4870_v59 = vld [vmem:[%s5134_s2 + $0x80] sm:$0xff] }
 0x738   :  { %v1645_v61 = vmul.f32 %v4477_v19, %v1629_v25  ;;  %v4333_v19 = vpack.c.bf16 %v4875_v60, %v4870_v59 }
 0x739   :  { %v1654_v63 = vmul.f32 %v3832_v13, %v1646_v20  ;;  %4324 = vmatpush3.bf16.msra.mxu1 %v4321_v0  ;;  %v4883_v20 = vld [vmem:[%s5134_s2 + $0xa0] sm:$0xff] }
 0x73a   :  { %v1653_v3 = vmul.f32 %v3832_v13, %v1645_v61  ;;  %4326 = vmatprep.subr.bf16.mxu1 %v4325_v9  ;;  %4334 = vmatprep.subr.bf16.mxu0 %v4333_v19  ;;  %v4888_v61 = vld [vmem:[%s5134_s2 + $0xb0] sm:$0xff] }
 0x73b   :  { %v1659_v5 = vadd.f32 %v1656_v62, %v1654_v63 }
 0x73c   :  { %v1658_v4 = vadd.f32 %v1656_v62, %v1653_v3  ;;  %v4337_v62 = vpack.c.bf16 %v4888_v61, %v4883_v20 }
 0x73d   :  { %4328 = vmatpush3.bf16.msra.mxu1 %v4325_v9 }
 0x73e   :  { %4132 = vmatprep.mubr.msk.f32.mxu0 %vm141_vm2, %v1658_v4  ;;  %4330 = vmatprep.subr.bf16.mxu1 %v4329_v17 }
 0x73f   :  { %4133 = vmatmul.mubr.msk.f32.vlgmr.msra.gmra.mrb[22].mxu0 %vm141_vm2, %v1659_v5 }
 0x740   :  { %4336 = vmatpush3.bf16.msra.mxu0 %v4333_v19 }
 0x741   :  { %4332 = vmatpush3.bf16.msra.mxu1 %v4329_v17  ;;  %4338 = vmatprep.subr.bf16.mxu0 %v4337_v62 }
 0x742   :  { %4175 = vmatprep.subr.mxu1 %v4538_v15 }
 0x744   :  { %4340 = vmatpush3.bf16.msra.mxu0 %v4337_v62 }
 0x745   :  { %4165 = vmatprep.subr.mxu0 %v4538_v15 }
 0x812   :  { %v4134_v18 = vpop.f32.mrb[22].mxu0 }
 0x813   :  { %v1741_v23 = vadd.f32 %v4134_v18, %v1661_v55  ;;  %v1735_v24 = vpop.f32.mrb[23].mxu0  ;;  %v4906_v18 = vld [vmem:[%s5135_s3 + $0x3] ss:$0 sm:$0xff] }
 0x814   :  { %v1736_v25 = vadd.f32 %v1735_v24, %v1661_v55 }
 0x815   :  { %v1747_v28 = vmul.f32 0.70710677, %v1741_v23  ;;  %v1745_v36 = vmul.f32 0.5, %v1741_v23 }
 0x816   :  { %v1746_v29 = vmul.f32 0.70710677, %v1736_v25  ;;  %v1744_v32 = vmul.f32 0.5, %v1736_v25 }
 0x817   :  { %4478 = verf.f32 %v1747_v28 }
 0x818   :  { %4480 = verf.f32 %v1746_v29 }
 0x821   :  { %v4479_v30 = vpop.eup %4478 }
 0x822   :  { %v4481_v14 = vpop.eup %4480  ;;  %v1751_v13 = vadd.f32 1.0, %v4479_v30 }
 0x823   :  { %v1750_v34 = vadd.f32 1.0, %v4481_v14 }
 0x824   :  { %v1753_v39 = vmul.f32 %v1751_v13, %v1745_v36 }
 0x825   :  { %v1752_v38 = vmul.f32 %v1750_v34, %v1744_v32 }
 0x827   :  { %4151 = vmatprep.mubr.msk.f32.mxu1 %vm1786_vm5, %v1752_v38 }
 0x828   :  { %4152 = vmatmul.mubr.msk.f32.vlgmr.msra.gmra.mrb[16].mxu1 %vm1786_vm5, %v1753_v39 }
 0x829   :  { %4177 = vmatprep.mubr.msk.f32.mxu1 %vm4539_vm3, %v4538_v15 }
 0x8fb   :  { %v4153_v40 = vpop.f32.mrb[16].mxu1 }
 0x8fc   :  { %v1869_v42 = vadd.f32 %v4153_v40, %v1659_v5  ;;  %v1859_v43 = vpop.f32.mrb[17].mxu1 }
 0x8fd   :  { %v1868_v44 = vadd.f32 %v1859_v43, %v1658_v4 }
 0x8fe   :  { %v1877_v45 = vadd.f32 %v3837_v41, %v1869_v42 }
 0x8ff   :  { %v1876_v46 = vadd.f32 %v3837_v41, %v1868_v44 }
 0x900   :  { %v1881_v47 = vsel %vm141_vm2, %v1877_v45, 0.0 }
 0x901   :  { %1882 = vadd.xlane.f32.xlu0 %v1881_v47  ;;  %v1878_v48 = vsel %vm141_vm2, %v1876_v46, 0.0 }
 0x902   :  { %1879 = vadd.xlane.f32.xlu1 %v1878_v48 }
 0x98e   :  { %v1883_v49 = vpop.xlane.xlu0 %1882 }
 0x98f   :  { %v1885_v50 = vmul.f32 0.03125, %v1883_v49  ;;  %v1880_v51 = vpop.xlane.xlu1 %1879 }
 0x990   :  { %v1884_v52 = vmul.f32 0.03125, %v1880_v51 }
 0x991   :  { %v1887_v53 = vsub.f32 %v1877_v45, %v1885_v50 }
 0x992   :  { %v1886_v54 = vsub.f32 %v1876_v46, %v1884_v52 }
 0x993   :  { %v1889_v55 = vmul.f32 %v1887_v53, %v1887_v53 }
 0x994   :  { %v1888_v56 = vmul.f32 %v1886_v54, %v1886_v54 }
 0x995   :  { %v1893_v57 = vsel %vm141_vm2, %v1889_v55, 0.0 }
 0x996   :  { %1894 = vadd.xlane.f32.xlu1 %v1893_v57  ;;  %v1890_v58 = vsel %vm141_vm2, %v1888_v56, 0.0 }
 0x997   :  { %1891 = vadd.xlane.f32.xlu0 %v1890_v58 }
 0x9a7   :  { %1909 = vrot.lane.b32.xlu1 %v3837_v41, %s4541_s23 }
 0x9ad   :  { %1904 = vrot.lane.b32.xlu0 %v3837_v41, %s4540_s6 }
 0xa23   :  { %v1895_v63 = vpop.xlane.xlu1 %1894 }
 0xa24   :  { %v1897_v3 = vmul.f32 0.03125, %v1895_v63  ;;  %v1892_v4 = vpop.xlane.xlu0 %1891 }
 0xa25   :  { %v1896_v5 = vmul.f32 0.03125, %v1892_v4 }
 0xa26   :  { %v1899_v7 = vadd.f32 1e-05, %v1897_v3 }
 0xa27   :  { %v1898_v8 = vadd.f32 1e-05, %v1896_v5  ;;  %v1910_v10 = vpop.permute.xlu1 %1909 }
 0xa28   :  { %4482 = vrsqrt.f32 %v1899_v7  ;;  %v1905_v0 = vpop.permute.xlu0 %1904 }
 0xa29   :  { %4484 = vrsqrt.f32 %v1898_v8 }
 0xa32   :  { %v4483_v16 = vpop.eup %4482 }
 0xa33   :  { %v4485_v1 = vpop.eup %4484  ;;  %v1903_v2 = vmul.f32 %v4483_v16, %v1887_v53 }
 0xa34   :  { %v1902_v6 = vmul.f32 %v4485_v1, %v1886_v54 }
 0xa35   :  { %v1908_v9 = vmul.f32 %v1905_v0, %v1903_v2 }
 0xa36   :  { %v1907_v11 = vmul.f32 %v1905_v0, %v1902_v6 }
 0xa37   :  { %v4895_v17 = vadd.f32 %v1910_v10, %v1908_v9 }
 0xa38   :  { %v4893_v12 = vadd.f32 %v1910_v10, %v1907_v11 }
 0xa3a   :  { %4162 = vmatprep.mubr.msk.f32.mxu0 %vm141_vm2, %v4893_v12 }
 0xa3b   :  { %4163 = vmatmul.mubr.msk.f32.vlgmr.msra.gmra.mrb[24].mxu0 %vm141_vm2, %v4895_v17 }
 0xa3c   :  { %4167 = vmatprep.mubr.msk.f32.mxu0 %vm4539_vm3, %v4538_v15 }
 0xb0e   :  { %v4164_v23 = vpop.f32.mrb[24].mxu0 }
 0xb0f   :  { %v4909_v24 = vadd.f32 %v4164_v23, %v4906_v18  ;;  %v2009_v25 = vpop.f32.mrb[25].mxu0 }
 0xb10   :  { %v4912_v28 = vadd.f32 %v4906_v18, %v2009_v25 }
 0xb11   :  { %2105 = vrot.lane.b32.xlu0 %v4909_v24, %s4540_s6  ;;  %v2023_v32 = vmul.f32 %v4909_v24, %v4708_v35 }
 0xb12   :  { %2027 = vrot.lane.b32.xlu1 %v4912_v28, %s4540_s6  ;;  %v2018_v30 = vmul.f32 %v4912_v28, %v4639_v21  ;;  %v2020_v14 = vmul.f32 %v4912_v28, %v4680_v31  ;;  %v2019_v21 = vmul.f32 %v4909_v24, %v4657_v26  ;;  %v2022_v31 = vmul.f32 %v4912_v28, %v4644_v22 }
 0xb13   :  { %v2021_v22 = vmul.f32 %v4909_v24, %v4696_v33  ;;  %v2024_v26 = vmul.f32 %v4912_v28, %v4662_v27  ;;  %v2025_v27 = vmul.f32 %v4909_v24, %v4720_v37 }
 0xb83   :  { %v2106_v13 = vpop.permute.xlu0 %2105 }
 0xb84   :  { %v2028_v29 = vpop.permute.xlu1 %2027 }
 0xb85   :  { %4166 = vmatpush3.xpose.msk.msra.mxu0 %vm141_vm2, %v2028_v29  ;;  %4176 = vmatpush3.xpose.msk.msra.mxu1 %vm141_vm2, %v2028_v29 }
 0xb86   :  { %4170 = vmatprep.subr.mxu0 %v4538_v15  ;;  %4185 = vmatprep.subr.mxu1 %v4538_v15 }
 0xb88   :  { %4168 = vmatmul.mubr.msk.f32.vlgmr.msra.gmra.mrb[26].mxu0 %vm141_vm2, %v2018_v30  ;;  %4178 = vmatmul.mubr.msk.f32.vlgmr.msra.gmra.mrb[18].mxu1 %vm141_vm2, %v2020_v14 }
 0xb89   :  { %4171 = vmatpush3.xpose.msk.msra.mxu0 %vm141_vm2, %v2106_v13  ;;  %4186 = vmatpush3.xpose.msk.msra.mxu1 %vm141_vm2, %v2028_v29 }
 0xb8a   :  { %4172 = vmatprep.mubr.msk.f32.mxu0 %vm4539_vm3, %v4538_v15  ;;  %4187 = vmatprep.mubr.msk.f32.mxu1 %vm4539_vm3, %v4538_v15 }
 0xb8b   :  { %4180 = vmatprep.subr.mxu0 %v4538_v15  ;;  %4195 = vmatprep.subr.mxu1 %v4538_v15 }
 0xb8c   :  { %4173 = vmatmul.mubr.msk.f32.vlgmr.msra.gmra.mrb[28].mxu0 %vm141_vm2, %v2019_v21  ;;  %4188 = vmatmul.mubr.msk.f32.vlgmr.msra.gmra.mrb[20].mxu1 %vm141_vm2, %v2022_v31 }
 0xb8d   :  { %4181 = vmatpush3.xpose.msk.msra.mxu0 %vm141_vm2, %v2106_v13  ;;  %4196 = vmatpush3.xpose.msk.msra.mxu1 %vm141_vm2, %v2028_v29 }
 0xb8e   :  { %4182 = vmatprep.mubr.msk.f32.mxu0 %vm4539_vm3, %v4538_v15  ;;  %4197 = vmatprep.mubr.msk.f32.mxu1 %vm4539_vm3, %v4538_v15 }
 0xb8f   :  { %4190 = vmatprep.subr.mxu0 %v4538_v15  ;;  %4205 = vmatprep.subr.mxu1 %v4538_v15 }
 0xb90   :  { %4183 = vmatmul.mubr.msk.f32.vlgmr.msra.gmra.mrb[30].mxu0 %vm141_vm2, %v2021_v22  ;;  %4198 = vmatmul.mubr.msk.f32.vlgmr.msra.gmra.mrb[22].mxu1 %vm141_vm2, %v2024_v26 }
 0xb91   :  { %4191 = vmatpush3.xpose.msk.msra.mxu0 %vm141_vm2, %v2106_v13  ;;  %4192 = vmatprep.mubr.msk.f32.mxu0 %vm4539_vm3, %v4538_v15 }
 0xb92   :  { %4200 = vmatprep.subr.mxu0 %v4538_v15  ;;  %4207 = vmatprep.mubr.msk.f32.mxu1 %vm4539_vm3, %v4538_v15 }
 0xb94   :  { %4193 = vmatmul.mubr.msk.f32.vlgmr.msra.gmra.mrb[32].mxu0 %vm141_vm2, %v2023_v32 }
 0xb95   :  { %4201 = vmatpush3.xpose.msk.msra.mxu0 %vm141_vm2, %v2106_v13  ;;  %4202 = vmatprep.mubr.msk.f32.mxu0 %vm4539_vm3, %v4538_v15 }
 0xb96   :  { %4210 = vmatprep.subr.mxu0 %v4538_v15 }
 0xb98   :  { %4203 = vmatmul.mubr.msk.f32.vlgmr.msra.gmra.mrb[34].mxu0 %vm141_vm2, %v2025_v27 }
 0xb99   :  { %4212 = vmatprep.mubr.msk.f32.mxu0 %vm4539_vm3, %v4538_v15 }
 0xc5b   :  { %v2100_v33 = vpop.f32.mrb[26].mxu0  ;;  %v2251_v35 = vpop.f32.mrb[18].mxu1 }
 0xc5c   :  { %v4169_v34 = vpop.f32.mrb[27].mxu0  ;;  %v4179_v36 = vpop.f32.mrb[19].mxu1  ;;  %v2620_v38 = vsel %vm825_vm4, %v2100_v33, -inf  ;;  %v2626_v47 = vsel %vm825_vm4, %v2251_v35, -inf }
 0xc5d   :  { %2621 = vmax.xlane.f32.xlu1 %v2620_v38 }
 0xc5f   :  { %v2178_v39 = vpop.f32.mrb[28].mxu0  ;;  %v2397_v40 = vpop.f32.mrb[20].mxu1 }
 0xc60   :  { %v4174_v41 = vpop.f32.mrb[29].mxu0  ;;  %v4189_v42 = vpop.f32.mrb[21].mxu1  ;;  %v2623_v37 = vsel %vm825_vm4, %v2178_v39, -inf  ;;  %v2632_v51 = vsel %vm825_vm4, %v2397_v40, -inf }
 0xc61   :  { %2624 = vmax.xlane.f32.xlu0 %v2623_v37 }
 0xc63   :  { %v2324_v43 = vpop.f32.mrb[30].mxu0  ;;  %v2543_v44 = vpop.f32.mrb[22].mxu1 }
 0xc64   :  { %v4184_v45 = vpop.f32.mrb[31].mxu0  ;;  %v4199_v46 = vpop.f32.mrb[23].mxu1  ;;  %v2629_v48 = vsel %vm825_vm4, %v2324_v43, -inf  ;;  %v2638_v55 = vsel %vm825_vm4, %v2543_v44, -inf }
 0xc65   :  { %2627 = vmax.xlane.f32.xlu0 %v2626_v47  ;;  %2630 = vmax.xlane.f32.xlu1 %v2629_v48 }
 0xc67   :  { %v2470_v49 = vpop.f32.mrb[32].mxu0 }
 0xc68   :  { %v4194_v50 = vpop.f32.mrb[33].mxu0  ;;  %v2635_v52 = vsel %vm825_vm4, %v2470_v49, -inf }
 0xc69   :  { %2633 = vmax.xlane.f32.xlu0 %v2632_v51  ;;  %2636 = vmax.xlane.f32.xlu1 %v2635_v52 }
 0xc6b   :  { %v2616_v53 = vpop.f32.mrb[34].mxu0 }
 0xc6c   :  { %v4204_v54 = vpop.f32.mrb[35].mxu0  ;;  %v2641_v56 = vsel %vm825_vm4, %v2616_v53, -inf }
 0xc6d   :  { %2639 = vmax.xlane.f32.xlu0 %v2638_v55  ;;  %2642 = vmax.xlane.f32.xlu1 %v2641_v56 }
 0xcea   :  { %v2622_v57 = vpop.xlane.xlu1 %2621 }
 0xceb   :  { %v2644_v58 = vsub.f32 %v2100_v33, %v2622_v57 }
 0xced   :  { %v2652_v19 = vmul.f32 1.442695, %v2644_v58 }
 0xcee   :  { %v2625_v62 = vpop.xlane.xlu0 %2624 }
 0xcef   :  { %4486 = vpow2.f32 %v2652_v19  ;;  %v2645_v63 = vsub.f32 %v2178_v39, %v2625_v62 }
 0xcf1   :  { %v2654_v3 = vmul.f32 1.442695, %v2645_v63 }
 0xcf2   :  { %v2628_v4 = vpop.xlane.xlu0 %2627  ;;  %v2631_v5 = vpop.xlane.xlu1 %2630 }
 0xcf3   :  { %4488 = vpow2.f32 %v2654_v3  ;;  %v2646_v7 = vsub.f32 %v2251_v35, %v2628_v4  ;;  %v2647_v8 = vsub.f32 %v2324_v43, %v2631_v5  ;;  %v4412_v43 = vpack.i.bf16 %v4875_v60, %v4870_v59 }
 0xcf5   :  { %v2656_v16 = vmul.f32 1.442695, %v2646_v7  ;;  %v2658_v0 = vmul.f32 1.442695, %v2647_v8 }
 0xcf6   :  { %v2634_v1 = vpop.xlane.xlu0 %2633  ;;  %v2637_v2 = vpop.xlane.xlu1 %2636 }
 0xcf7   :  { %4490 = vpow2.f32 %v2656_v16  ;;  %v2648_v6 = vsub.f32 %v2397_v40, %v2634_v1  ;;  %v2649_v9 = vsub.f32 %v2470_v49, %v2637_v2 }
 0xcf8   :  { %4492 = vpow2.f32 %v2658_v0 }
 0xcf9   :  { %v4487_v10 = vpop.eup %4486  ;;  %v2660_v11 = vmul.f32 1.442695, %v2648_v6  ;;  %v2662_v23 = vmul.f32 1.442695, %v2649_v9 }
 0xcfa   :  { %v2640_v25 = vpop.xlane.xlu0 %2639  ;;  %v2643_v29 = vpop.xlane.xlu1 %2642  ;;  %v2668_v30 = vsel %vm825_vm4, %v4487_v10, 0.0 }
 0xcfb   :  { %4494 = vpow2.f32 %v2660_v11  ;;  %v2650_v14 = vsub.f32 %v2543_v44, %v2640_v25  ;;  %v2651_v13 = vsub.f32 %v2616_v53, %v2643_v29  ;;  %2669 = vadd.xlane.f32.xlu0 %v2668_v30  ;;  %v4417_v44 = vpack.i.bf16 %v4888_v61, %v4883_v20  ;;  %v4530_v29 = vld [vmem:[%s5132_s1 + $0x10] sm:$0xff] }
 0xcfc   :  { %4496 = vpow2.f32 %v2662_v23 }
 0xcfd   :  { %v4489_v21 = vpop.eup %4488  ;;  %v2664_v31 = vmul.f32 1.442695, %v2650_v14  ;;  %v2666_v22 = vmul.f32 1.442695, %v2651_v13  ;;  %v4531_v14 = vld [vmem:[%s5132_s1 + $0x20] sm:$0xff] }
 0xcfe   :  { %v2671_v26 = vsel %vm825_vm4, %v4489_v21, 0.0 }
 0xcff   :  { %4498 = vpow2.f32 %v2664_v31  ;;  %2672 = vadd.xlane.f32.xlu1 %v2671_v26 }
 0xd00   :  { %4500 = vpow2.f32 %v2666_v22  ;;  %v4532_v22 = vld [vmem:[%s5132_s1 + $0x18] sm:$0xff] }
 0xd01   :  { %v4491_v32 = vpop.eup %4490 }
 0xd02   :  { %v4493_v27 = vpop.eup %4492  ;;  %v2674_v33 = vsel %vm825_vm4, %v4491_v32, 0.0 }
 0xd03   :  { %2675 = vadd.xlane.f32.xlu0 %v2674_v33  ;;  %v2677_v35 = vsel %vm825_vm4, %v4493_v27, 0.0 }
 0xd04   :  { %2678 = vadd.xlane.f32.xlu1 %v2677_v35 }
 0xd05   :  { %v4495_v34 = vpop.eup %4494 }
 0xd06   :  { %v4986_v36 = vpop.eup %4496  ;;  %v2680_v38 = vsel %vm825_vm4, %v4495_v34, 0.0 }
 0xd07   :  { %2681 = vadd.xlane.f32.xlu0 %v2680_v38  ;;  %v2683_v39 = vsel %vm825_vm4, %v4986_v36, 0.0  ;;  %v4534_v38 = vld [vmem:[%s5132_s1 + $0x30] sm:$0xff] }
 0xd08   :  { %2684 = vadd.xlane.f32.xlu1 %v2683_v39 }
 0xd09   :  { %v4991_v40 = vpop.eup %4498 }
 0xd0a   :  { %v4993_v41 = vpop.eup %4500  ;;  %v2686_v42 = vsel %vm825_vm4, %v4991_v40, 0.0 }
 0xd0b   :  { %2687 = vadd.xlane.f32.xlu0 %v2686_v42  ;;  %v2689_v37 = vsel %vm825_vm4, %v4993_v41, 0.0  ;;  %v4535_v42 = vld [vmem:[%s5132_s1 + $0x38] sm:$0xff] }
 0xd0c   :  { %2690 = vadd.xlane.f32.xlu1 %v2689_v37 }
 0xd1d   :  { %2784 = vrot.lane.b32.xlu1 %v4909_v24, %s4541_s23 }
 0xd21   :  { %2708 = vrot.lane.b32.xlu0 %v4912_v28, %s4541_s23  ;;  %4413 = vrot.lane.b32.xlu1 %v4412_v43, %s4542_s24 }
 0xd25   :  { %4418 = vrot.lane.b32.xlu0 %v4417_v44, %s4542_s24  ;;  %3328 = vrot.lane.b32.xlu1 %v4906_v18, %s4542_s24 }
 0xd88   :  { %v2670_v45 = vpop.xlane.xlu0 %2669 }
 0xd89   :  { %4502 = vrcp.f32 %v2670_v45 }
 0xd8c   :  { %v2673_v46 = vpop.xlane.xlu1 %2672 }
 0xd8d   :  { %4504 = vrcp.f32 %v2673_v46 }
 0xd90   :  { %v2676_v24 = vpop.xlane.xlu0 %2675 }
 0xd91   :  { %v2679_v47 = vpop.xlane.xlu1 %2678  ;;  %4506 = vrcp.f32 %v2676_v24  ;;  %v4536_v24 = vld [vmem:[%s5132_s1 + $0x40] sm:$0xff] }
 0xd92   :  { %4508 = vrcp.f32 %v2679_v47 }
 0xd93   :  { %v4503_v20 = vpop.eup %4502 }
 0xd94   :  { %v2682_v28 = vpop.xlane.xlu0 %2681  ;;  %v2693_v49 = vmul.f32 %v4503_v20, %v4487_v10 }
 0xd95   :  { %v2685_v59 = vpop.xlane.xlu1 %2684  ;;  %4510 = vrcp.f32 %v2682_v28 }
 0xd96   :  { %4512 = vrcp.f32 %v2685_v59 }
 0xd97   :  { %v4505_v48 = vpop.eup %4504 }
 0xd98   :  { %v2688_v60 = vpop.xlane.xlu0 %2687  ;;  %v2695_v18 = vmul.f32 %v4505_v48, %v4489_v21 }
 0xd99   :  { %v2691_v61 = vpop.xlane.xlu1 %2690  ;;  %4514 = vrcp.f32 %v2688_v60  ;;  %v4537_v60 = vld [vmem:[%s5132_s1 + $0x48] sm:$0xff] }
 0xd9a   :  { %4516 = vrcp.f32 %v2691_v61 }
 0xd9b   :  { %v4507_v52 = vpop.eup %4506 }
 0xd9c   :  { %v2709_v50 = vpop.permute.xlu0 %2708  ;;  %v4509_v53 = vpop.eup %4508  ;;  %v2697_v54 = vmul.f32 %v4507_v52, %v4491_v32  ;;  %v4533_v32 = vld [vmem:[%s5132_s1 + $0x28] sm:$0xff] }
 0xd9d   :  { %v2785_v51 = vpop.permute.xlu1 %2784  ;;  %4206 = vmatpush3.msra.mxu1 %v2709_v50  ;;  %v2699_v56 = vmul.f32 %v4509_v53, %v4493_v27 }
 0xd9e   :  { %4211 = vmatpush3.msra.mxu0 %v2785_v51  ;;  %4208 = vmatmul.mubr.msk.f32.vlgmr.msra.gmra.mrb[24].mxu1 %vm825_vm4, %v2693_v49 }
 0xd9f   :  { %4213 = vmatmul.mubr.msk.f32.vlgmr.msra.gmra.mrb[36].mxu0 %vm825_vm4, %v2695_v18  ;;  %4215 = vmatprep.subr.mxu1 %v4538_v15  ;;  %v4511_v55 = vpop.eup %4510 }
 0xda0   :  { %4220 = vmatprep.subr.mxu0 %v4538_v15  ;;  %4216 = vmatpush3.msra.mxu1 %v2709_v50  ;;  %v4513_v57 = vpop.eup %4512  ;;  %v2701_v58 = vmul.f32 %v4511_v55, %v4495_v34  ;;  %v4419_v0 = vpop.permute.xlu0 %4418 }
 0xda1   :  { %4221 = vmatpush3.msra.mxu0 %v2785_v51  ;;  %4217 = vmatprep.mubr.msk.f32.mxu1 %vm4539_vm3, %v4538_v15  ;;  %v2703_v62 = vmul.f32 %v4513_v57, %v4986_v36  ;;  %v4414_v5 = vpop.permute.xlu1 %4413  ;;  %v4421_v1 = vunpack.i.h.bf16 %v4419_v0  ;;  %v4420_v2 = vunpack.i.l.bf16 %v4419_v0  ;;  %v3843_v0 = vld [vmem:[%s5134_s2 + $0x98] sm:$0xff] }
 0xda2   :  { %4222 = vmatprep.mubr.msk.f32.mxu0 %vm4539_vm3, %v4538_v15  ;;  %4225 = vmatprep.subr.mxu1 %v4538_v15  ;;  %v4416_v7 = vunpack.i.h.bf16 %v4414_v5  ;;  %v4415_v8 = vunpack.i.l.bf16 %v4414_v5 }
 0xda3   :  { %4230 = vmatprep.subr.mxu0 %v4538_v15  ;;  %4218 = vmatmul.mubr.msk.f32.vlgmr.msra.gmra.mrb[26].mxu1 %vm825_vm4, %v2697_v54  ;;  %v4515_v19 = vpop.eup %4514  ;;  %v4345_v6 = vpack.c.bf16 %v4421_v1, %v4420_v2  ;;  %v3844_v2 = vld [vmem:[%s5134_s2 + $0xa8] sm:$0xff] }
 0xda4   :  { %4223 = vmatmul.mubr.msk.f32.vlgmr.msra.gmra.mrb[38].mxu0 %vm825_vm4, %v2699_v56  ;;  %4226 = vmatpush3.msra.mxu1 %v2709_v50  ;;  %v4517_v63 = vpop.eup %4516  ;;  %v2705_v3 = vmul.f32 %v4515_v19, %v4991_v40  ;;  %v4341_v16 = vpack.c.bf16 %v4416_v7, %v4415_v8 }
 0xda5   :  { %4231 = vmatpush3.msra.mxu0 %v2785_v51  ;;  %4227 = vmatprep.mubr.msk.f32.mxu1 %vm4539_vm3, %v4538_v15  ;;  %v2707_v4 = vmul.f32 %v4517_v63, %v4993_v41 }
 0xda6   :  { %4232 = vmatprep.mubr.msk.f32.mxu0 %vm4539_vm3, %v4538_v15  ;;  %4235 = vmatprep.subr.mxu1 %v4538_v15 }
 0xda7   :  { %4240 = vmatprep.subr.mxu0 %v4538_v15  ;;  %4228 = vmatmul.mubr.msk.f32.vlgmr.msra.gmra.mrb[28].mxu1 %vm825_vm4, %v2701_v58  ;;  %v3882_v58 = vld [vmem:[%s5135_s3 + $0x4] ss:$0 sm:$0xff] }
 0xda8   :  { %4233 = vmatmul.mubr.msk.f32.vlgmr.msra.gmra.mrb[40].mxu0 %vm825_vm4, %v2703_v62  ;;  %4236 = vmatpush3.msra.mxu1 %v2709_v50  ;;  %v3329_v50 = vpop.permute.xlu1 %3328 }
 0xda9   :  { %4241 = vmatpush3.msra.mxu0 %v2785_v51  ;;  %4237 = vmatprep.mubr.msk.f32.mxu1 %vm4539_vm3, %v4538_v15 }
 0xdaa   :  { %4242 = vmatprep.mubr.msk.f32.mxu0 %vm4539_vm3, %v4538_v15  ;;  %4342 = vmatprep.subr.bf16.mxu1 %v4341_v16 }
 0xdab   :  { %4238 = vmatmul.mubr.msk.f32.vlgmr.msra.gmra.mrb[30].mxu1 %vm825_vm4, %v2705_v3 }
 0xdac   :  { %4243 = vmatmul.mubr.msk.f32.vlgmr.msra.gmra.mrb[42].mxu0 %vm825_vm4, %v2707_v4  ;;  %4344 = vmatpush3.bf16.msra.mxu1 %v4341_v16  ;;  %v3842_v16 = vld [vmem:[%s5134_s2 + $0x88] sm:$0xff] }
 0xdad   :  { %4346 = vmatprep.subr.bf16.mxu1 %v4345_v6  ;;  %v4349_v1 = vpack.c.bf16 %v3843_v0, %v3842_v16 }
 0xdaf   :  { %4350 = vmatprep.subr.bf16.mxu0 %v4349_v1 }
 0xdb0   :  { %4348 = vmatpush3.bf16.msra.mxu1 %v4345_v6  ;;  %4352 = vmatpush3.bf16.msra.mxu0 %v4349_v1  ;;  %v3845_v6 = vld [vmem:[%s5134_s2 + $0xb8] sm:$0xff] }
 0xe71   :  { %v2780_v9 = vpop.f32.mrb[24].mxu1 }
 0xe72   :  { %v2856_v10 = vpop.f32.mrb[36].mxu0  ;;  %v4209_v11 = vpop.f32.mrb[25].mxu1  ;;  %v3298_v30 = vmul.f32 %v4530_v29, %v2780_v9  ;;  %v4353_v9 = vpack.c.bf16 %v3845_v6, %v3844_v2  ;;  %v4427_v29 = vpack.i.bf16 %v3845_v6, %v3844_v2 }
 0xe73   :  { %v4214_v23 = vpop.f32.mrb[37].mxu0  ;;  %v3299_v26 = vmul.f32 %v4532_v22, %v2856_v10  ;;  %v4422_v10 = vpack.i.bf16 %v3843_v0, %v3842_v16  ;;  %v3846_v11 = vld [vmem:[%s5134_s2 + $0xc8] sm:$0xff] }
 0xe74   :  { %4354 = vmatprep.subr.bf16.mxu0 %v4353_v9  ;;  %v3847_v23 = vld [vmem:[%s5134_s2 + $0xd8] sm:$0xff] }
 0xe75   :  { %4356 = vmatpush3.bf16.msra.mxu0 %v4353_v9 }
 0xe76   :  { %v2929_v25 = vpop.f32.mrb[26].mxu1 }
 0xe77   :  { %v3300_v13 = vmul.f32 %v4531_v14, %v2929_v25  ;;  %v3002_v21 = vpop.f32.mrb[38].mxu0  ;;  %v4219_v31 = vpop.f32.mrb[27].mxu1  ;;  %v4432_v25 = vpack.i.bf16 %v3847_v23, %v3846_v11  ;;  %v3849_v14 = vld [vmem:[%s5134_s2 + $0xf8] sm:$0xff] }
 0xe78   :  { %v3301_v27 = vmul.f32 %v4533_v32, %v3002_v21  ;;  %v4224_v33 = vpop.f32.mrb[39].mxu0 }
 0xe79   :  { %v3306_v35 = vadd.f32 %v3300_v13, %v3298_v30  ;;  %v3848_v30 = vld [vmem:[%s5134_s2 + $0xe8] sm:$0xff] }
 0xe7a   :  { %v3307_v34 = vadd.f32 %v3301_v27, %v3299_v26  ;;  %v3075_v36 = vpop.f32.mrb[28].mxu1  ;;  %v4437_v13 = vpack.i.bf16 %v3849_v14, %v3848_v30 }
 0xe7b   :  { %v3302_v39 = vmul.f32 %v4534_v38, %v3075_v36  ;;  %v3148_v40 = vpop.f32.mrb[40].mxu0  ;;  %v4229_v41 = vpop.f32.mrb[29].mxu1 }
 0xe7c   :  { %v3303_v37 = vmul.f32 %v4535_v42, %v3148_v40  ;;  %v4234_v43 = vpop.f32.mrb[41].mxu0 }
 0xe7d   :  { %v3308_v44 = vadd.f32 %v3306_v35, %v3302_v39 }
 0xe7e   :  { %v3309_v45 = vadd.f32 %v3307_v34, %v3303_v37  ;;  %v3221_v46 = vpop.f32.mrb[30].mxu1 }
 0xe7f   :  { %v3304_v47 = vmul.f32 %v4536_v24, %v3221_v46  ;;  %v3294_v28 = vpop.f32.mrb[42].mxu0  ;;  %v4239_v59 = vpop.f32.mrb[31].mxu1 }
 0xe80   :  { %v3305_v20 = vmul.f32 %v4537_v60, %v3294_v28  ;;  %v4244_v61 = vpop.f32.mrb[43].mxu0 }
 0xe81   :  { %v3310_v48 = vadd.f32 %v3308_v44, %v3304_v47 }
 0xe82   :  { %v3311_v49 = vadd.f32 %v3309_v45, %v3305_v20 }
 0xe83   :  { %4253 = vmatprep.mubr.msk.f32.mxu1 %vm141_vm2, %v3310_v48 }
 0xe84   :  { %4254 = vmatmul.mubr.msk.f32.vlgmr.msra.gmra.mrb[32].mxu1 %vm141_vm2, %v3311_v49 }
 0xf57   :  { %v4255_v18 = vpop.f32.mrb[32].mxu1 }
 0xf58   :  { %v3409_v51 = vadd.f32 %v4255_v18, %v3329_v50  ;;  %v3403_v52 = vpop.f32.mrb[33].mxu1 }
 0xf59   :  { %v3404_v53 = vadd.f32 %v3403_v52, %v3329_v50 }
 0xf5a   :  { %v3413_v54 = vadd.f32 %v3409_v51, %v4895_v17 }
 0xf5b   :  { %v3412_v55 = vadd.f32 %v3404_v53, %v4893_v12 }
 0xf5c   :  { %v3417_v56 = vsel %vm141_vm2, %v3413_v54, 0.0 }
 0xf5d   :  { %3418 = vadd.xlane.f32.xlu1 %v3417_v56  ;;  %v3414_v57 = vsel %vm141_vm2, %v3412_v55, 0.0 }
 0xf5e   :  { %3415 = vadd.xlane.f32.xlu0 %v3414_v57 }
 0xf6e   :  { %3448 = vrot.lane.b32.xlu1 %v3882_v58, %s4540_s6 }
 0xf72   :  { %4423 = vrot.lane.b32.xlu1 %v4422_v10, %s4541_s23 }
 0xf76   :  { %4428 = vrot.lane.b32.xlu1 %v4427_v29, %s4541_s23 }
 0xf7a   :  { %4438 = vrot.lane.b32.xlu1 %v4437_v13, %s4541_s23 }
 0xfea   :  { %v3419_v19 = vpop.xlane.xlu1 %3418 }
 0xfeb   :  { %v3421_v62 = vmul.f32 0.03125, %v3419_v19  ;;  %v3416_v63 = vpop.xlane.xlu0 %3415 }
 0xfec   :  { %v3420_v3 = vmul.f32 0.03125, %v3416_v63 }
 0xfed   :  { %v3423_v4 = vsub.f32 %v3413_v54, %v3421_v62 }
 0xfee   :  { %v3422_v17 = vsub.f32 %v3412_v55, %v3420_v3  ;;  %v3449_v34 = vpop.permute.xlu1 %3448 }
 0xfef   :  { %v3425_v7 = vmul.f32 %v3423_v4, %v3423_v4 }
 0xff0   :  { %v3424_v5 = vmul.f32 %v3422_v17, %v3422_v17 }
 0xff1   :  { %v3429_v8 = vsel %vm141_vm2, %v3425_v7, 0.0 }
 0xff2   :  { %v3426_v12 = vsel %vm141_vm2, %v3424_v5, 0.0  ;;  %v4424_v37 = vpop.permute.xlu1 %4423 }
 0xff3   :  { %3427 = vadd.xlane.f32.xlu0 %v3426_v12  ;;  %v4426_v43 = vunpack.i.h.bf16 %v4424_v37  ;;  %v4425_v44 = vunpack.i.l.bf16 %v4424_v37  ;;  %v3887_v12 = vld [vmem:[%s5135_s3 + $0x5] ss:$0 sm:$0xff] }
 0xff5   :  { %v4357_v45 = vpack.c.bf16 %v4426_v43, %v4425_v44 }
 0xff6   :  { %v4429_v24 = vpop.permute.xlu1 %4428 }
 0xff7   :  { %3430 = vadd.xlane.f32.xlu0 %v3429_v8  ;;  %v4431_v47 = vunpack.i.h.bf16 %v4429_v24  ;;  %v4430_v28 = vunpack.i.l.bf16 %v4429_v24  ;;  %4358 = vmatprep.subr.bf16.mxu1 %v4357_v45  ;;  %v3889_v24 = vld [vmem:[%s5132_s1 + $0x4] ss:$0 sm:$0xff] }
 0xff8   :  { %4360 = vmatpush3.bf16.msra.mxu1 %v4357_v45 }
 0xff9   :  { %v4361_v59 = vpack.c.bf16 %v4431_v47, %v4430_v28 }
 0xffa   :  { %v4439_v49 = vpop.permute.xlu1 %4438 }
 0xffb   :  { %4362 = vmatprep.subr.bf16.mxu1 %v4361_v59  ;;  %v4441_v50 = vunpack.i.h.bf16 %v4439_v49 }
 0xffc   :  { %4364 = vmatpush3.bf16.msra.mxu1 %v4361_v59 }
0x100d   :  { %3453 = vrot.lane.b32.xlu0 %v3882_v58, %s4541_s23 }
0x1011   :  { %4433 = vrot.lane.b32.xlu0 %v4432_v25, %s4541_s23 }
0x1080   :  { %v3428_v21 = vpop.xlane.xlu0 %3427 }
0x1081   :  { %v3432_v31 = vmul.f32 0.03125, %v3428_v21 }
0x1083   :  { %v3434_v22 = vadd.f32 1e-05, %v3432_v31  ;;  %v4543_v31 = vmov 0.0|0.0  }
0x1084   :  { %v3431_v26 = vpop.xlane.xlu0 %3430  ;;  %4373 = vmatprep.subr.bf16.mxu0 %v4543_v31 }
0x1085   :  { %4518 = vrsqrt.f32 %v3434_v22  ;;  %v3433_v32 = vmul.f32 0.03125, %v3431_v26 }
0x1087   :  { %v3435_v27 = vadd.f32 1e-05, %v3433_v32 }
0x1088   :  { %v3454_v46 = vpop.permute.xlu0 %3453 }
0x1089   :  { %4520 = vrsqrt.f32 %v3435_v27 }
0x108c   :  { %v4434_v60 = vpop.permute.xlu0 %4433 }
0x108d   :  { %v4436_v20 = vunpack.i.h.bf16 %v4434_v60  ;;  %v4435_v61 = vunpack.i.l.bf16 %v4434_v60 }
0x108f   :  { %v4519_v33 = vpop.eup %4518  ;;  %v4365_v48 = vpack.c.bf16 %v4436_v20, %v4435_v61  ;;  %v3890_v20 = vld [vmem:[%s5132_s1 + $0x5] ss:$0 sm:$0xff] }
0x1090   :  { %v3438_v35 = vmul.f32 %v4519_v33, %v3422_v17 }
0x1091   :  { %4366 = vmatprep.subr.bf16.mxu1 %v4365_v48 }
0x1092   :  { %v3446_v36 = vmul.f32 %v3882_v58, %v3438_v35  ;;  %4368 = vmatpush3.bf16.msra.mxu1 %v4365_v48 }
0x1093   :  { %v4521_v38 = vpop.eup %4520 }
0x1094   :  { %v3439_v39 = vmul.f32 %v4521_v38, %v3423_v4  ;;  %v3451_v40 = vadd.f32 %v3449_v34, %v3446_v36 }
0x1096   :  { %v3447_v41 = vmul.f32 %v3882_v58, %v3439_v39  ;;  %4264 = vmatprep.mubr.msk.f32.mxu0 %vm141_vm2, %v3451_v40 }
0x1098   :  { %v3452_v42 = vadd.f32 %v3449_v34, %v3447_v41 }
0x109a   :  { %4265 = vmatmul.mubr.msk.f32.vlgmr.msra.gmra.mrb[44].mxu0 %vm141_vm2, %v3452_v42 }
0x109b   :  { %4290 = vmatprep.mubr.msk.f32.mxu0 %vm4539_vm3, %v4538_v15  ;;  %v4440_v15 = vunpack.i.l.bf16 %v4439_v49 }
0x109d   :  { %v4369_v18 = vpack.c.bf16 %v4441_v50, %v4440_v15 }
0x109f   :  { %4370 = vmatprep.subr.bf16.mxu1 %v4369_v18 }
0x10a0   :  { %4372 = vmatpush3.bf16.msra.mxu1 %v4369_v18 }
0x116d   :  { %v4266_v51 = vpop.f32.mrb[44].mxu0 }
0x116e   :  { %v3534_v52 = vadd.f32 %v4266_v51, %v3454_v46  ;;  %v3528_v53 = vpop.f32.mrb[45].mxu0 }
0x116f   :  { %v3529_v54 = vadd.f32 %v3528_v53, %v3454_v46  ;;  %v29_v46 = vld [vmem:[%s5132_s1 + $0x50] sm:$0x3] }
0x1170   :  { %v3540_v55 = vmul.f32 0.70710677, %v3534_v52  ;;  %v3538_v3 = vmul.f32 0.5, %v3534_v52 }
0x1171   :  { %v3539_v56 = vmul.f32 0.70710677, %v3529_v54  ;;  %v3537_v62 = vmul.f32 0.5, %v3529_v54 }
0x1172   :  { %4522 = verf.f32 %v3540_v55 }
0x1173   :  { %4524 = verf.f32 %v3539_v56 }
0x117c   :  { %v4523_v57 = vpop.eup %4522 }
0x117d   :  { %v4525_v58 = vpop.eup %4524  ;;  %v3544_v19 = vadd.f32 1.0, %v4523_v57 }
0x117e   :  { %v3543_v63 = vadd.f32 1.0, %v4525_v58 }
0x117f   :  { %v3546_v17 = vmul.f32 %v3544_v19, %v3538_v3 }
0x1180   :  { %v3545_v4 = vmul.f32 %v3543_v63, %v3537_v62 }
0x1182   :  { %4283 = vmatprep.mubr.msk.f32.mxu1 %vm1786_vm5, %v3545_v4 }
0x1183   :  { %4284 = vmatmul.mubr.msk.f32.vlgmr.msra.gmra.mrb[34].mxu1 %vm1786_vm5, %v3546_v17 }
0x1256   :  { %v4285_v5 = vpop.f32.mrb[34].mxu1 }
0x1257   :  { %v3661_v7 = vadd.f32 %v4285_v5, %v3452_v42  ;;  %v3651_v8 = vpop.f32.mrb[35].mxu1 }
0x1258   :  { %v3660_v16 = vadd.f32 %v3651_v8, %v3451_v40 }
0x1259   :  { %v3669_v0 = vadd.f32 %v3887_v12, %v3661_v7 }
0x125a   :  { %v3668_v1 = vadd.f32 %v3887_v12, %v3660_v16 }
0x125b   :  { %v3673_v2 = vsel %vm141_vm2, %v3669_v0, 0.0 }
0x125c   :  { %3674 = vadd.xlane.f32.xlu1 %v3673_v2  ;;  %v3670_v6 = vsel %vm141_vm2, %v3668_v1, 0.0 }
0x125d   :  { %3671 = vadd.xlane.f32.xlu0 %v3670_v6 }
0x126d   :  { %3696 = vrot.lane.b32.xlu1 %v3887_v12, %s4540_s6 }
0x12e9   :  { %v3675_v9 = vpop.xlane.xlu1 %3674 }
0x12ea   :  { %v3677_v10 = vmul.f32 0.03125, %v3675_v9  ;;  %v3672_v11 = vpop.xlane.xlu0 %3671 }
0x12eb   :  { %v3676_v23 = vmul.f32 0.03125, %v3672_v11 }
0x12ec   :  { %v3679_v25 = vsub.f32 %v3669_v0, %v3677_v10 }
0x12ed   :  { %v3678_v29 = vsub.f32 %v3668_v1, %v3676_v23  ;;  %v3697_v38 = vpop.permute.xlu1 %3696 }
0x12ee   :  { %v3681_v13 = vmul.f32 %v3679_v25, %v3679_v25 }
0x12ef   :  { %v3680_v30 = vmul.f32 %v3678_v29, %v3678_v29 }
0x12f0   :  { %v3685_v21 = vsel %vm141_vm2, %v3681_v13, 0.0 }
0x12f1   :  { %v3682_v14 = vsel %vm141_vm2, %v3680_v30, 0.0 }
0x12f2   :  { %3683 = vadd.xlane.f32.xlu0 %v3682_v14 }
0x12f6   :  { %3686 = vadd.xlane.f32.xlu0 %v3685_v21 }
0x130c   :  { %3701 = vrot.lane.b32.xlu0 %v3887_v12, %s4541_s23 }
0x137f   :  { %v3684_v22 = vpop.xlane.xlu0 %3683 }
0x1380   :  { %v3688_v26 = vmul.f32 0.03125, %v3684_v22 }
0x1382   :  { %v3690_v32 = vadd.f32 1e-05, %v3688_v26 }
0x1383   :  { %v3687_v27 = vpop.xlane.xlu0 %3686 }
0x1384   :  { %4526 = vrsqrt.f32 %v3690_v32  ;;  %v3689_v33 = vmul.f32 0.03125, %v3687_v27 }
0x1386   :  { %v3691_v35 = vadd.f32 1e-05, %v3689_v33 }
0x1387   :  { %v3702_v42 = vpop.permute.xlu0 %3701 }
0x1388   :  { %4528 = vrsqrt.f32 %v3691_v35 }
0x138e   :  { %v4527_v34 = vpop.eup %4526 }
0x138f   :  { %v3694_v36 = vmul.f32 %v4527_v34, %v3678_v29 }
0x1391   :  { %v3699_v41 = vmul.f32 %v3697_v38, %v3694_v36 }
0x1392   :  { %v4529_v39 = vpop.eup %4528 }
0x1393   :  { %v3695_v40 = vmul.f32 %v4529_v39, %v3679_v25  ;;  %v3704_v43 = vadd.f32 %v3702_v42, %v3699_v41 }
0x1395   :  { %v3700_v37 = vmul.f32 %v3697_v38, %v3695_v40 }
0x1397   :  { %v3705_v44 = vadd.f32 %v3702_v42, %v3700_v37 }
0x1399   :  { %v4374_v45 = vpack.c.bf16 %v3705_v44, %v3704_v43 }
0x139b   :  { %4375 = vmatpush3.bf16.msra.mxu0 %v4374_v45 }
0x139e   :  { %4291 = vmatmul.mubr.msk.f32.vlgmr.msra.gmra.mrb[46].mxu0 %vm3706_vm6, %v29_v46 }
0x1471   :  { %v3776_v47 = vpop.f32.mrb[46].mxu0 }
0x1472   :  { %v3784_v28 = vmul.f32 %v3889_v24, %v3776_v47  ;;  %v4292_v59 = vpop.f32.mrb[47].mxu0 }
0x1474   :  { %v3786_v60 = vsel %vm3785_vm7, %v3784_v28, 0.0 }
0x1475   :  { %3787 = vadd.xlane.f32.xlu1 %v3786_v60 }
0x1502   :  { %v3788_v61 = vpop.xlane.xlu1 %3787 }
0x1503   :  { %v3793_v48 = vadd.f32 %v3890_v20, %v3788_v61 }
0x1505   :  { %3795 = vst.msk [vmem:[%s5136_s4] sm:$0x3] %vm3794_vm8, %v3793_v48 }

</bundles_post_ra>
